<compile_context>
chip_gen: v7x
topology: tpu7x:2x2x1
jax: 0.10.0
libtpu: 0.0.40
codegen_flags: <defaults>
</compile_context>

<pallas_src>
import functools

import jax
import jax.numpy as jnp
from jax.experimental import pallas as pl
from jax.experimental.pallas import tpu as pltpu


def _round_up(x: int, m: int) -> int:
    return (x + m - 1) // m * m


# --------------------------------------------------------------------------- #
# Sequential (recurrent) kernel: only the h-dependent work lives here.
# --------------------------------------------------------------------------- #
def _gru_recurrent_kernel(p_ref, h0_ref, u_zr_ref, uh_ref, out_ref, h_state, *, dp):
    """One grid step == TS GRU time steps.

    p_ref:    (TS, Bp, 3*dp) f32  precomputed x-side pre-activations [z|r|h] (+bias)
    h0_ref:   (Bp, dp)       f32  initial hidden state (only read at t == 0)
    u_zr_ref: (dp, 2*dp)          [Uz | Ur]  (VMEM-resident, constant index_map)
    uh_ref:   (dp, dp)            Uh         (VMEM-resident, constant index_map)
    out_ref:  (TS, Bp, dp)        hidden state after each of the TS steps
    h_state:  (Bp, dp)       f32  VMEM scratch carrying h across grid steps
    """
    @pl.when(pl.program_id(0) == 0)
    def _init():
        h_state[...] = h0_ref[...]

    u_zr = u_zr_ref[...]          # resident recurrent weights
    u_h = uh_ref[...]
    w_dtype = u_zr.dtype
    ts = p_ref.shape[0]

    def step(s, h):
        p = p_ref[s]                                              # (Bp, 3*dp) f32
        zr = jnp.dot(h.astype(w_dtype), u_zr,
                     preferred_element_type=jnp.float32)          # (Bp, 2*dp) f32
        z = jax.nn.sigmoid(p[:, 0:dp] + zr[:, 0:dp])
        r = jax.nn.sigmoid(p[:, dp:2 * dp] + zr[:, dp:2 * dp])
        h_hat = jnp.tanh(
            p[:, 2 * dp:3 * dp]
            + jnp.dot((r * h).astype(w_dtype), u_h,
                      preferred_element_type=jnp.float32))
        h_new = (1.0 - z) * h + z * h_hat
        out_ref[s] = h_new.astype(out_ref.dtype)
        return h_new

    # Unrolled inner loop over TS steps (feedback item: multi-step blocking).
    h_state[...] = jax.lax.fori_loop(0, ts, step, h_state[...], unroll=True)


# --------------------------------------------------------------------------- #
# Parameter packing
# --------------------------------------------------------------------------- #
def _pack_params(params, d_in, d_out, dp, w_dtype):
    """Fuse + lane-pad the weights/biases.

    Padded-lane invariant (relied upon by the kernel): every padded row, column
    and bias lane is EXACTLY zero.  h0's padded lanes are zero, so padded gate
    lanes evaluate sigmoid(0)=0.5 while h_hat's padded lanes stay tanh(0)=0,
    hence h's padded lanes remain 0 for the whole sequence and can never leak
    into real lanes through Uh.  Do not replace the zero padding.
    """
    w_z, u_z, w_r, u_r, w_h, u_h, bz, br, bh = params

    # x-side slab: (d_in, 3*dp) = [Wz | Wr | Wh]   (used only in the hoisted matmul)
    wx = jnp.zeros((d_in, 3 * dp), w_dtype)
    wx = wx.at[:, 0:d_out].set(w_z.astype(w_dtype))
    wx = wx.at[:, dp:dp + d_out].set(w_r.astype(w_dtype))
    wx = wx.at[:, 2 * dp:2 * dp + d_out].set(w_h.astype(w_dtype))

    # h-side slab for z/r: (dp, 2*dp) = [Uz | Ur]  (no zero Uh block any more)
    u_zr = jnp.zeros((dp, 2 * dp), w_dtype)
    u_zr = u_zr.at[:d_out, 0:d_out].set(u_z.astype(w_dtype))
    u_zr = u_zr.at[:d_out, dp:dp + d_out].set(u_r.astype(w_dtype))

    uh_p = jnp.zeros((dp, dp), w_dtype).at[:d_out, :d_out].set(u_h.astype(w_dtype))

    b_all = jnp.zeros((1, 3 * dp), jnp.float32)
    b_all = b_all.at[:, 0:d_out].set(bz)
    b_all = b_all.at[:, dp:dp + d_out].set(br)
    b_all = b_all.at[:, 2 * dp:2 * dp + d_out].set(bh)
    return wx, u_zr, uh_p, b_all


# --------------------------------------------------------------------------- #
# Wrapper
# --------------------------------------------------------------------------- #
def gru_sequence(x_seq, h0, params, *, ts=8, compute_dtype=jnp.bfloat16):
    """Run the GRU over a sequence.  x_seq: (T, B, D_in), h0: (B, D_out).

    Returns (T, B, D_out): the hidden state after every step (exactly what the
    PyTorch module's forward() returns on successive calls).
    """
    T, B, d_in = x_seq.shape
    d_out = h0.shape[-1]

    dp = _round_up(d_out, 128)          # lane-padded hidden size
    b_pad = _round_up(B, 8)             # sublane-padded batch
    ts = max(1, min(ts, T))
    t_pad = _round_up(T, ts)

    wx, u_zr, u_h, b_all = _pack_params(params, d_in, d_out, dp, compute_dtype)

    # ----- hoisted x-side projection: one large, MXU-efficient matmul -------- #
    # (T*B, d_in) @ (d_in, 3*dp).  This work has no temporal dependence, so it
    # must not sit on the serial per-step path inside the kernel.
    p = jnp.dot(x_seq.reshape(T * B, d_in).astype(compute_dtype), wx,
                preferred_element_type=jnp.float32) + b_all       # (T*B, 3*dp) f32
    p = p.reshape(T, B, 3 * dp)
    if (t_pad, b_pad) != (T, B):                                  # pad only if needed
        p = jnp.zeros((t_pad, b_pad, 3 * dp), jnp.float32).at[:T, :B, :].set(p)

    if (b_pad, dp) != (B, d_out):
        h0_p = (jnp.zeros((b_pad, dp), jnp.float32)
                .at[:B, :d_out].set(h0.astype(jnp.float32)))
    else:
        h0_p = h0.astype(jnp.float32)

    out_dtype = x_seq.dtype
    w_bytes = jnp.dtype(compute_dtype).itemsize
    o_bytes = jnp.dtype(out_dtype).itemsize
    # Explicit VMEM budget (scoped default is only 16 MiB on v5e / 32 MiB on v6e+):
    # double-buffered P/out blocks + (conservatively doubled) resident weights +
    # h0 + carried-h scratch + headroom, clamped to v7x's 64 MiB physical VMEM.
    vmem_est = (2 * ts * b_pad * 3 * dp * 4
                + 2 * ts * b_pad * dp * o_bytes
                + 2 * (dp * 2 * dp + dp * dp) * w_bytes
                + 2 * b_pad * dp * 4
                + b_pad * dp * 4)
    vmem_limit = int(min(max(vmem_est + (4 << 20), 16 << 20), 64 << 20))

    out = pl.pallas_call(
        functools.partial(_gru_recurrent_kernel, dp=dp),
        out_shape=jax.ShapeDtypeStruct((t_pad, b_pad, dp), out_dtype),
        grid_spec=pltpu.PrefetchScalarGridSpec(
            num_scalar_prefetch=0,
            grid=(t_pad // ts,),
            in_specs=[
                pl.BlockSpec((ts, b_pad, 3 * dp), lambda t: (t, 0, 0)),  # P, TS steps
                pl.BlockSpec((b_pad, dp), lambda t: (0, 0)),             # h0 (resident)
                pl.BlockSpec((dp, 2 * dp), lambda t: (0, 0)),            # [Uz|Ur] (resident)
                pl.BlockSpec((dp, dp), lambda t: (0, 0)),                # Uh (resident)
            ],
            out_specs=pl.BlockSpec((ts, b_pad, dp), lambda t: (t, 0, 0)),
            scratch_shapes=[pltpu.VMEM((b_pad, dp), jnp.float32)],       # carried h
        ),
        compiler_params=pltpu.CompilerParams(
            dimension_semantics=("arbitrary",),     # time axis carries a dependency
            vmem_limit_bytes=vmem_limit,
        ),
    )(p, h0_p, u_zr, u_h)

    return out[:T, :B, :d_out]


def gru_cell(x, h, params, *, compute_dtype=jnp.bfloat16):
    """Single-step forward, identical to one call of the PyTorch module's forward()."""
    return gru_sequence(x[None], h, params, ts=1, compute_dtype=compute_dtype)[0]


# --------------------------------------------------------------------------- #
# Init + pure-JAX references
# --------------------------------------------------------------------------- #
def init_params(key, input_size, output_size):
    """Deterministic init mimicking nn.Linear (uniform +/- 1/sqrt(fan_in)) and
    torch.rand for the extra gate biases.  Linear biases + extra biases are folded."""
    ks = jax.random.split(key, 15)

    def lin(kw, kb, fan_in, fan_out):
        bound = 1.0 / jnp.sqrt(fan_in)
        w = jax.random.uniform(kw, (fan_in, fan_out), jnp.float32, -bound, bound)
        b = jax.random.uniform(kb, (1, fan_out), jnp.float32, -bound, bound)
        return w, b

    w_z, bw_z = lin(ks[0], ks[1], input_size, output_size)
    u_z, bu_z = lin(ks[2], ks[3], output_size, output_size)
    w_r, bw_r = lin(ks[4], ks[5], input_size, output_size)
    u_r, bu_r = lin(ks[6], ks[7], output_size, output_size)
    w_h, bw_h = lin(ks[8], ks[9], input_size, output_size)
    u_h, bu_h = lin(ks[10], ks[11], output_size, output_size)

    # extra per-gate biases: torch.rand -> uniform [0, 1)
    b_z = jax.random.uniform(ks[12], (1, output_size), jnp.float32)
    b_r = jax.random.uniform(ks[13], (1, output_size), jnp.float32)
    b_h = jax.random.uniform(ks[14], (1, output_size), jnp.float32)

    return (w_z, u_z, w_r, u_r, w_h, u_h,
            bw_z + bu_z + b_z, bw_r + bu_r + b_r, bw_h + bu_h + b_h)


def gru_step_ref(x, h, params):
    """Pure-JAX f32 single-step reference mirroring the PyTorch forward()."""
    w_z, u_z, w_r, u_r, w_h, u_h, bz, br, bh = params
    z = jax.nn.sigmoid(x @ w_z + h @ u_z + bz)
    r = jax.nn.sigmoid(x @ w_r + h @ u_r + br)
    h_hat = jnp.tanh(x @ w_h + (r * h) @ u_h + bh)
    return (1.0 - z) * h + z * h_hat


def gru_sequence_ref(x_seq, h0, params, compute_dtype=jnp.float32):
    """Pure-JAX sequence reference mirroring the kernel's numerics: matmul
    operands cast to compute_dtype, f32 accumulation and f32 element-wise math."""
    w_z, u_z, w_r, u_r, w_h, u_h, bz, br, bh = params
    cd = compute_dtype
    wz, wr, wh, uz, ur, uh = (m.astype(cd) for m in (w_z, w_r, w_h, u_z, u_r, u_h))

    def step(h, x):
        xb = x.astype(cd)
        hb = h.astype(cd)
        z = jax.nn.sigmoid(jnp.dot(xb, wz, preferred_element_type=jnp.float32) + bz
                           + jnp.dot(hb, uz, preferred_element_type=jnp.float32))
        r = jax.nn.sigmoid(jnp.dot(xb, wr, preferred_element_type=jnp.float32) + br
                           + jnp.dot(hb, ur, preferred_element_type=jnp.float32))
        h_hat = jnp.tanh(jnp.dot(xb, wh, preferred_element_type=jnp.float32) + bh
                         + jnp.dot((r * h).astype(cd), uh,
                                   preferred_element_type=jnp.float32))
        h_new = (1.0 - z) * h + z * h_hat
        return h_new, h_new

    _, ys = jax.lax.scan(step, h0.astype(jnp.float32), x_seq)
    return ys


# --------------------------------------------------------------------------- #
# Self-test
# --------------------------------------------------------------------------- #
if __name__ == "__main__":
    input_size = 16
    output_size = 32
    batch = 8
    seq_len = 20     # not a multiple of ts=8 -> exercises the time-padding path

    key = jax.random.PRNGKey(0)
    k_param, k_x = jax.random.split(key)
    params = init_params(k_param, input_size, output_size)

    x_seq = jax.random.normal(k_x, (seq_len, batch, input_size), jnp.float32)
    # Default module state self.h_t = zeros(1, output_size); broadcast to batch.
    h0 = jnp.zeros((batch, output_size), jnp.float32)

    # Module-exact f32 reference: one forward() per step.
    refs = []
    h = h0
    for t in range(seq_len):
        h = gru_step_ref(x_seq[t], h, params)
        refs.append(h)
    ref_seq_f32 = jnp.stack(refs)

    # 1) f32 kernel path: must match the module's f32 math.
    out_f32 = jax.block_until_ready(
        gru_sequence(x_seq, h0, params, ts=8, compute_dtype=jnp.float32))
    assert out_f32.shape == (seq_len, batch, output_size)
    assert jnp.allclose(out_f32, ref_seq_f32, atol=1e-3, rtol=1e-3), (
        "f32 sequence mismatch vs module reference: "
        f"max abs diff {jnp.max(jnp.abs(out_f32 - ref_seq_f32))}")

    # 2) bf16 fast path (default): must match a reference with identical
    #    bf16-operand / f32-accumulate numerics.
    out_bf16 = jax.block_until_ready(
        gru_sequence(x_seq, h0, params, ts=8, compute_dtype=jnp.bfloat16))
    ref_seq_bf16 = gru_sequence_ref(x_seq, h0, params, jnp.bfloat16)
    assert out_bf16.shape == (seq_len, batch, output_size)
    assert jnp.allclose(out_bf16, ref_seq_bf16, atol=2e-3, rtol=2e-3), (
        "bf16 sequence mismatch vs bf16-numerics reference: "
        f"max abs diff {jnp.max(jnp.abs(out_bf16 - ref_seq_bf16))}")

    # 3) Single-step path (exactly one module forward() call).
    out_1 = jax.block_until_ready(gru_cell(x_seq[0], h0, params))
    ref_1 = gru_sequence_ref(x_seq[:1], h0, params, jnp.bfloat16)[0]
    assert out_1.shape == (batch, output_size)
    assert jnp.allclose(out_1, ref_1, atol=2e-3, rtol=2e-3), "single-step mismatch"

    print("KERNEL_OK")
</pallas_src>

<mosaic_0001>
module attributes {stable_mosaic.version = 11 : i64} {
  func.func @_gru_recurrent_kernel(%arg0: i32, %arg1: memref<8x8x384xf32, #tpu.memory_space<vmem>>, %arg2: memref<8x128xf32, #tpu.memory_space<vmem>>, %arg3: memref<128x256xf32, #tpu.memory_space<vmem>>, %arg4: memref<128x128xf32, #tpu.memory_space<vmem>>, %arg5: memref<8x8x128xf32, #tpu.memory_space<vmem>>, %arg6: memref<8x128xf32, #tpu.memory_space<vmem>>) attributes {dimension_semantics = [#tpu.dimension_semantics<arbitrary>], iteration_bounds = array<i64: 3>, scalar_prefetch = 0 : i64, scratch_operands = 1 : i64, tpu.core_type = #tpu.core_type<tc>, window_params = [{transform_indices = @transform_0, window_bounds = array<i64: 8, 8, 384>}, {pipeline_mode = #tpu.pipeline_mode<synchronous>, transform_indices = @transform_1, window_bounds = array<i64: 8, 128>}, {pipeline_mode = #tpu.pipeline_mode<synchronous>, transform_indices = @transform_2, window_bounds = array<i64: 128, 256>}, {pipeline_mode = #tpu.pipeline_mode<synchronous>, transform_indices = @transform_3, window_bounds = array<i64: 128, 128>}, {transform_indices = @transform_4, window_bounds = array<i64: 8, 8, 128>}]} {
    %c0_i32 = arith.constant 0 : i32
    %0 = arith.cmpi eq, %arg0, %c0_i32 : i32
    %1 = arith.extui %0 : i1 to i32
    %c0_i32_0 = arith.constant 0 : i32
    %2 = arith.cmpi ne, %1, %c0_i32_0 : i32
    scf.if %2 {
      %c0_80 = arith.constant 0 : index
      %c0_81 = arith.constant 0 : index
      %279 = vector.load %arg2[%c0_80, %c0_81] : memref<8x128xf32, #tpu.memory_space<vmem>>, vector<8x128xf32>
      %c0_82 = arith.constant 0 : index
      %c0_83 = arith.constant 0 : index
      %280 = vector.load %arg6[%c0_82, %c0_83] : memref<8x128xf32, #tpu.memory_space<vmem>>, vector<8x128xf32>
      tpu.vector_store %arg6[%c0_82, %c0_83], %279 {strides = array<i32>} : memref<8x128xf32, #tpu.memory_space<vmem>>, vector<8x128xf32>,
    } else {
    }
    %c0 = arith.constant 0 : index
    %c0_1 = arith.constant 0 : index
    %3 = vector.load %arg3[%c0, %c0_1] : memref<128x256xf32, #tpu.memory_space<vmem>>, vector<128x256xf32>
    %c0_2 = arith.constant 0 : index
    %c0_3 = arith.constant 0 : index
    %4 = vector.load %arg4[%c0_2, %c0_3] : memref<128x128xf32, #tpu.memory_space<vmem>>, vector<128x128xf32>
    %c0_4 = arith.constant 0 : index
    %c0_5 = arith.constant 0 : index
    %5 = vector.load %arg6[%c0_4, %c0_5] : memref<8x128xf32, #tpu.memory_space<vmem>>, vector<8x128xf32>
    %c0_i32_6 = arith.constant 0 : i32
    %6 = arith.index_cast %c0_i32_6 : i32 to index
    %c0_7 = arith.constant 0 : index
    %c0_8 = arith.constant 0 : index
    %7 = vector.load %arg1[%6, %c0_7, %c0_8] : memref<8x8x384xf32, #tpu.memory_space<vmem>>, vector<1x8x384xf32>
    %8 = vector.shape_cast %7 : vector<1x8x384xf32> to vector<8x384xf32>
    %cst = arith.constant dense<0.000000e+00> : vector<8x256xf32>
    %9 = tpu.matmul %5, %3, %cst {dimension_numbers = #tpu.dot_dimension_numbers<[1], [0], [0], [1], [0, 0, 1, 1], [], []>} : vector<8x128xf32>, vector<128x256xf32>, vector<8x256xf32> -> vector<8x256xf32>
    %10 = vector.extract_strided_slice %8 {offsets = [0, 0], sizes = [8, 128], strides = [1, 1]} : vector<8x384xf32> to vector<8x128xf32>
    %11 = vector.extract_strided_slice %9 {offsets = [0, 0], sizes = [8, 128], strides = [1, 1]} : vector<8x256xf32> to vector<8x128xf32>
    %12 = arith.addf %10, %11 : vector<8x128xf32>
    %13 = arith.negf %12 : vector<8x128xf32>
    %14 = math.exp %13 : vector<8x128xf32>
    %cst_9 = arith.constant 1.000000e+00 : f32
    %15 = vector.broadcast %cst_9 : f32 to vector<8x128xf32>
    %16 = arith.addf %15, %14 : vector<8x128xf32>
    %17 = arith.divf %15, %16 : vector<8x128xf32>
    %18 = vector.extract_strided_slice %8 {offsets = [0, 128], sizes = [8, 128], strides = [1, 1]} : vector<8x384xf32> to vector<8x128xf32>
    %19 = vector.extract_strided_slice %9 {offsets = [0, 128], sizes = [8, 128], strides = [1, 1]} : vector<8x256xf32> to vector<8x128xf32>
    %20 = arith.addf %18, %19 : vector<8x128xf32>
    %21 = arith.negf %20 : vector<8x128xf32>
    %22 = math.exp %21 : vector<8x128xf32>
    %cst_10 = arith.constant 1.000000e+00 : f32
    %23 = vector.broadcast %cst_10 : f32 to vector<8x128xf32>
    %24 = arith.addf %23, %22 : vector<8x128xf32>
    %25 = arith.divf %23, %24 : vector<8x128xf32>
    %26 = vector.extract_strided_slice %8 {offsets = [0, 256], sizes = [8, 128], strides = [1, 1]} : vector<8x384xf32> to vector<8x128xf32>
    %27 = arith.mulf %25, %5 : vector<8x128xf32>
    %cst_11 = arith.constant dense<0.000000e+00> : vector<8x128xf32>
    %28 = tpu.matmul %27, %4, %cst_11 {dimension_numbers = #tpu.dot_dimension_numbers<[1], [0], [0], [1], [0, 0, 1, 1], [], []>} : vector<8x128xf32>, vector<128x128xf32>, vector<8x128xf32> -> vector<8x128xf32>
    %29 = arith.addf %26, %28 : vector<8x128xf32>
    %30 = math.tanh %29 : vector<8x128xf32>
    %cst_12 = arith.constant 1.000000e+00 : f32
    %31 = vector.broadcast %cst_12 : f32 to vector<8x128xf32>
    %32 = arith.subf %31, %17 : vector<8x128xf32>
    %33 = arith.mulf %32, %5 : vector<8x128xf32>
    %34 = arith.mulf %17, %30 : vector<8x128xf32>
    %35 = arith.addf %33, %34 : vector<8x128xf32>
    %36 = arith.index_cast %c0_i32_6 : i32 to index
    %c0_13 = arith.constant 0 : index
    %c0_14 = arith.constant 0 : index
    %37 = vector.load %arg5[%36, %c0_13, %c0_14] : memref<8x8x128xf32, #tpu.memory_space<vmem>>, vector<1x8x128xf32>
    %38 = vector.shape_cast %37 : vector<1x8x128xf32> to vector<8x128xf32>
    %39 = vector.shape_cast %35 : vector<8x128xf32> to vector<1x8x128xf32>
    tpu.vector_store %arg5[%36, %c0_13, %c0_14], %39 {strides = array<i32>} : memref<8x8x128xf32, #tpu.memory_space<vmem>>, vector<1x8x128xf32>,
    %c1_i32 = arith.constant 1 : i32
    %40 = arith.index_cast %c1_i32 : i32 to index
    %c0_15 = arith.constant 0 : index
    %c0_16 = arith.constant 0 : index
    %41 = vector.load %arg1[%40, %c0_15, %c0_16] : memref<8x8x384xf32, #tpu.memory_space<vmem>>, vector<1x8x384xf32>
    %42 = vector.shape_cast %41 : vector<1x8x384xf32> to vector<8x384xf32>
    %cst_17 = arith.constant dense<0.000000e+00> : vector<8x256xf32>
    %43 = tpu.matmul %35, %3, %cst_17 {dimension_numbers = #tpu.dot_dimension_numbers<[1], [0], [0], [1], [0, 0, 1, 1], [], []>} : vector<8x128xf32>, vector<128x256xf32>, vector<8x256xf32> -> vector<8x256xf32>
    %44 = vector.extract_strided_slice %42 {offsets = [0, 0], sizes = [8, 128], strides = [1, 1]} : vector<8x384xf32> to vector<8x128xf32>
    %45 = vector.extract_strided_slice %43 {offsets = [0, 0], sizes = [8, 128], strides = [1, 1]} : vector<8x256xf32> to vector<8x128xf32>
    %46 = arith.addf %44, %45 : vector<8x128xf32>
    %47 = arith.negf %46 : vector<8x128xf32>
    %48 = math.exp %47 : vector<8x128xf32>
    %cst_18 = arith.constant 1.000000e+00 : f32
    %49 = vector.broadcast %cst_18 : f32 to vector<8x128xf32>
    %50 = arith.addf %49, %48 : vector<8x128xf32>
    %51 = arith.divf %49, %50 : vector<8x128xf32>
    %52 = vector.extract_strided_slice %42 {offsets = [0, 128], sizes = [8, 128], strides = [1, 1]} : vector<8x384xf32> to vector<8x128xf32>
    %53 = vector.extract_strided_slice %43 {offsets = [0, 128], sizes = [8, 128], strides = [1, 1]} : vector<8x256xf32> to vector<8x128xf32>
    %54 = arith.addf %52, %53 : vector<8x128xf32>
    %55 = arith.negf %54 : vector<8x128xf32>
    %56 = math.exp %55 : vector<8x128xf32>
    %cst_19 = arith.constant 1.000000e+00 : f32
    %57 = vector.broadcast %cst_19 : f32 to vector<8x128xf32>
    %58 = arith.addf %57, %56 : vector<8x128xf32>
    %59 = arith.divf %57, %58 : vector<8x128xf32>
    %60 = vector.extract_strided_slice %42 {offsets = [0, 256], sizes = [8, 128], strides = [1, 1]} : vector<8x384xf32> to vector<8x128xf32>
    %61 = arith.mulf %59, %35 : vector<8x128xf32>
    %cst_20 = arith.constant dense<0.000000e+00> : vector<8x128xf32>
    %62 = tpu.matmul %61, %4, %cst_20 {dimension_numbers = #tpu.dot_dimension_numbers<[1], [0], [0], [1], [0, 0, 1, 1], [], []>} : vector<8x128xf32>, vector<128x128xf32>, vector<8x128xf32> -> vector<8x128xf32>
    %63 = arith.addf %60, %62 : vector<8x128xf32>
    %64 = math.tanh %63 : vector<8x128xf32>
    %cst_21 = arith.constant 1.000000e+00 : f32
    %65 = vector.broadcast %cst_21 : f32 to vector<8x128xf32>
    %66 = arith.subf %65, %51 : vector<8x128xf32>
    %67 = arith.mulf %66, %35 : vector<8x128xf32>
    %68 = arith.mulf %51, %64 : vector<8x128xf32>
    %69 = arith.addf %67, %68 : vector<8x128xf32>
    %70 = arith.index_cast %c1_i32 : i32 to index
    %c0_22 = arith.constant 0 : index
    %c0_23 = arith.constant 0 : index
    %71 = vector.load %arg5[%70, %c0_22, %c0_23] : memref<8x8x128xf32, #tpu.memory_space<vmem>>, vector<1x8x128xf32>
    %72 = vector.shape_cast %71 : vector<1x8x128xf32> to vector<8x128xf32>
    %73 = vector.shape_cast %69 : vector<8x128xf32> to vector<1x8x128xf32>
    tpu.vector_store %arg5[%70, %c0_22, %c0_23], %73 {strides = array<i32>} : memref<8x8x128xf32, #tpu.memory_space<vmem>>, vector<1x8x128xf32>,
    %c2_i32 = arith.constant 2 : i32
    %74 = arith.index_cast %c2_i32 : i32 to index
    %c0_24 = arith.constant 0 : index
    %c0_25 = arith.constant 0 : index
    %75 = vector.load %arg1[%74, %c0_24, %c0_25] : memref<8x8x384xf32, #tpu.memory_space<vmem>>, vector<1x8x384xf32>
    %76 = vector.shape_cast %75 : vector<1x8x384xf32> to vector<8x384xf32>
    %cst_26 = arith.constant dense<0.000000e+00> : vector<8x256xf32>
    %77 = tpu.matmul %69, %3, %cst_26 {dimension_numbers = #tpu.dot_dimension_numbers<[1], [0], [0], [1], [0, 0, 1, 1], [], []>} : vector<8x128xf32>, vector<128x256xf32>, vector<8x256xf32> -> vector<8x256xf32>
    %78 = vector.extract_strided_slice %76 {offsets = [0, 0], sizes = [8, 128], strides = [1, 1]} : vector<8x384xf32> to vector<8x128xf32>
    %79 = vector.extract_strided_slice %77 {offsets = [0, 0], sizes = [8, 128], strides = [1, 1]} : vector<8x256xf32> to vector<8x128xf32>
    %80 = arith.addf %78, %79 : vector<8x128xf32>
    %81 = arith.negf %80 : vector<8x128xf32>
    %82 = math.exp %81 : vector<8x128xf32>
    %cst_27 = arith.constant 1.000000e+00 : f32
    %83 = vector.broadcast %cst_27 : f32 to vector<8x128xf32>
    %84 = arith.addf %83, %82 : vector<8x128xf32>
    %85 = arith.divf %83, %84 : vector<8x128xf32>
    %86 = vector.extract_strided_slice %76 {offsets = [0, 128], sizes = [8, 128], strides = [1, 1]} : vector<8x384xf32> to vector<8x128xf32>
    %87 = vector.extract_strided_slice %77 {offsets = [0, 128], sizes = [8, 128], strides = [1, 1]} : vector<8x256xf32> to vector<8x128xf32>
    %88 = arith.addf %86, %87 : vector<8x128xf32>
    %89 = arith.negf %88 : vector<8x128xf32>
    %90 = math.exp %89 : vector<8x128xf32>
    %cst_28 = arith.constant 1.000000e+00 : f32
    %91 = vector.broadcast %cst_28 : f32 to vector<8x128xf32>
    %92 = arith.addf %91, %90 : vector<8x128xf32>
    %93 = arith.divf %91, %92 : vector<8x128xf32>
    %94 = vector.extract_strided_slice %76 {offsets = [0, 256], sizes = [8, 128], strides = [1, 1]} : vector<8x384xf32> to vector<8x128xf32>
    %95 = arith.mulf %93, %69 : vector<8x128xf32>
    %cst_29 = arith.constant dense<0.000000e+00> : vector<8x128xf32>
    %96 = tpu.matmul %95, %4, %cst_29 {dimension_numbers = #tpu.dot_dimension_numbers<[1], [0], [0], [1], [0, 0, 1, 1], [], []>} : vector<8x128xf32>, vector<128x128xf32>, vector<8x128xf32> -> vector<8x128xf32>
    %97 = arith.addf %94, %96 : vector<8x128xf32>
    %98 = math.tanh %97 : vector<8x128xf32>
    %cst_30 = arith.constant 1.000000e+00 : f32
    %99 = vector.broadcast %cst_30 : f32 to vector<8x128xf32>
    %100 = arith.subf %99, %85 : vector<8x128xf32>
    %101 = arith.mulf %100, %69 : vector<8x128xf32>
    %102 = arith.mulf %85, %98 : vector<8x128xf32>
    %103 = arith.addf %101, %102 : vector<8x128xf32>
    %104 = arith.index_cast %c2_i32 : i32 to index
    %c0_31 = arith.constant 0 : index
    %c0_32 = arith.constant 0 : index
    %105 = vector.load %arg5[%104, %c0_31, %c0_32] : memref<8x8x128xf32, #tpu.memory_space<vmem>>, vector<1x8x128xf32>
    %106 = vector.shape_cast %105 : vector<1x8x128xf32> to vector<8x128xf32>
    %107 = vector.shape_cast %103 : vector<8x128xf32> to vector<1x8x128xf32>
    tpu.vector_store %arg5[%104, %c0_31, %c0_32], %107 {strides = array<i32>} : memref<8x8x128xf32, #tpu.memory_space<vmem>>, vector<1x8x128xf32>,
    %c3_i32 = arith.constant 3 : i32
    %108 = arith.index_cast %c3_i32 : i32 to index
    %c0_33 = arith.constant 0 : index
    %c0_34 = arith.constant 0 : index
    %109 = vector.load %arg1[%108, %c0_33, %c0_34] : memref<8x8x384xf32, #tpu.memory_space<vmem>>, vector<1x8x384xf32>
    %110 = vector.shape_cast %109 : vector<1x8x384xf32> to vector<8x384xf32>
    %cst_35 = arith.constant dense<0.000000e+00> : vector<8x256xf32>
    %111 = tpu.matmul %103, %3, %cst_35 {dimension_numbers = #tpu.dot_dimension_numbers<[1], [0], [0], [1], [0, 0, 1, 1], [], []>} : vector<8x128xf32>, vector<128x256xf32>, vector<8x256xf32> -> vector<8x256xf32>
    %112 = vector.extract_strided_slice %110 {offsets = [0, 0], sizes = [8, 128], strides = [1, 1]} : vector<8x384xf32> to vector<8x128xf32>
    %113 = vector.extract_strided_slice %111 {offsets = [0, 0], sizes = [8, 128], strides = [1, 1]} : vector<8x256xf32> to vector<8x128xf32>
    %114 = arith.addf %112, %113 : vector<8x128xf32>
    %115 = arith.negf %114 : vector<8x128xf32>
    %116 = math.exp %115 : vector<8x128xf32>
    %cst_36 = arith.constant 1.000000e+00 : f32
    %117 = vector.broadcast %cst_36 : f32 to vector<8x128xf32>
    %118 = arith.addf %117, %116 : vector<8x128xf32>
    %119 = arith.divf %117, %118 : vector<8x128xf32>
    %120 = vector.extract_strided_slice %110 {offsets = [0, 128], sizes = [8, 128], strides = [1, 1]} : vector<8x384xf32> to vector<8x128xf32>
    %121 = vector.extract_strided_slice %111 {offsets = [0, 128], sizes = [8, 128], strides = [1, 1]} : vector<8x256xf32> to vector<8x128xf32>
    %122 = arith.addf %120, %121 : vector<8x128xf32>
    %123 = arith.negf %122 : vector<8x128xf32>
    %124 = math.exp %123 : vector<8x128xf32>
    %cst_37 = arith.constant 1.000000e+00 : f32
    %125 = vector.broadcast %cst_37 : f32 to vector<8x128xf32>
    %126 = arith.addf %125, %124 : vector<8x128xf32>
    %127 = arith.divf %125, %126 : vector<8x128xf32>
    %128 = vector.extract_strided_slice %110 {offsets = [0, 256], sizes = [8, 128], strides = [1, 1]} : vector<8x384xf32> to vector<8x128xf32>
    %129 = arith.mulf %127, %103 : vector<8x128xf32>
    %cst_38 = arith.constant dense<0.000000e+00> : vector<8x128xf32>
    %130 = tpu.matmul %129, %4, %cst_38 {dimension_numbers = #tpu.dot_dimension_numbers<[1], [0], [0], [1], [0, 0, 1, 1], [], []>} : vector<8x128xf32>, vector<128x128xf32>, vector<8x128xf32> -> vector<8x128xf32>
    %131 = arith.addf %128, %130 : vector<8x128xf32>
    %132 = math.tanh %131 : vector<8x128xf32>
    %cst_39 = arith.constant 1.000000e+00 : f32
    %133 = vector.broadcast %cst_39 : f32 to vector<8x128xf32>
    %134 = arith.subf %133, %119 : vector<8x128xf32>
    %135 = arith.mulf %134, %103 : vector<8x128xf32>
    %136 = arith.mulf %119, %132 : vector<8x128xf32>
    %137 = arith.addf %135, %136 : vector<8x128xf32>
    %138 = arith.index_cast %c3_i32 : i32 to index
    %c0_40 = arith.constant 0 : index
    %c0_41 = arith.constant 0 : index
    %139 = vector.load %arg5[%138, %c0_40, %c0_41] : memref<8x8x128xf32, #tpu.memory_space<vmem>>, vector<1x8x128xf32>
    %140 = vector.shape_cast %139 : vector<1x8x128xf32> to vector<8x128xf32>
    %141 = vector.shape_cast %137 : vector<8x128xf32> to vector<1x8x128xf32>
    tpu.vector_store %arg5[%138, %c0_40, %c0_41], %141 {strides = array<i32>} : memref<8x8x128xf32, #tpu.memory_space<vmem>>, vector<1x8x128xf32>,
    %c4_i32 = arith.constant 4 : i32
    %142 = arith.index_cast %c4_i32 : i32 to index
    %c0_42 = arith.constant 0 : index
    %c0_43 = arith.constant 0 : index
    %143 = vector.load %arg1[%142, %c0_42, %c0_43] : memref<8x8x384xf32, #tpu.memory_space<vmem>>, vector<1x8x384xf32>
    %144 = vector.shape_cast %143 : vector<1x8x384xf32> to vector<8x384xf32>
    %cst_44 = arith.constant dense<0.000000e+00> : vector<8x256xf32>
    %145 = tpu.matmul %137, %3, %cst_44 {dimension_numbers = #tpu.dot_dimension_numbers<[1], [0], [0], [1], [0, 0, 1, 1], [], []>} : vector<8x128xf32>, vector<128x256xf32>, vector<8x256xf32> -> vector<8x256xf32>
    %146 = vector.extract_strided_slice %144 {offsets = [0, 0], sizes = [8, 128], strides = [1, 1]} : vector<8x384xf32> to vector<8x128xf32>
    %147 = vector.extract_strided_slice %145 {offsets = [0, 0], sizes = [8, 128], strides = [1, 1]} : vector<8x256xf32> to vector<8x128xf32>
    %148 = arith.addf %146, %147 : vector<8x128xf32>
    %149 = arith.negf %148 : vector<8x128xf32>
    %150 = math.exp %149 : vector<8x128xf32>
    %cst_45 = arith.constant 1.000000e+00 : f32
    %151 = vector.broadcast %cst_45 : f32 to vector<8x128xf32>
    %152 = arith.addf %151, %150 : vector<8x128xf32>
    %153 = arith.divf %151, %152 : vector<8x128xf32>
    %154 = vector.extract_strided_slice %144 {offsets = [0, 128], sizes = [8, 128], strides = [1, 1]} : vector<8x384xf32> to vector<8x128xf32>
    %155 = vector.extract_strided_slice %145 {offsets = [0, 128], sizes = [8, 128], strides = [1, 1]} : vector<8x256xf32> to vector<8x128xf32>
    %156 = arith.addf %154, %155 : vector<8x128xf32>
    %157 = arith.negf %156 : vector<8x128xf32>
    %158 = math.exp %157 : vector<8x128xf32>
    %cst_46 = arith.constant 1.000000e+00 : f32
    %159 = vector.broadcast %cst_46 : f32 to vector<8x128xf32>
    %160 = arith.addf %159, %158 : vector<8x128xf32>
    %161 = arith.divf %159, %160 : vector<8x128xf32>
    %162 = vector.extract_strided_slice %144 {offsets = [0, 256], sizes = [8, 128], strides = [1, 1]} : vector<8x384xf32> to vector<8x128xf32>
    %163 = arith.mulf %161, %137 : vector<8x128xf32>
    %cst_47 = arith.constant dense<0.000000e+00> : vector<8x128xf32>
    %164 = tpu.matmul %163, %4, %cst_47 {dimension_numbers = #tpu.dot_dimension_numbers<[1], [0], [0], [1], [0, 0, 1, 1], [], []>} : vector<8x128xf32>, vector<128x128xf32>, vector<8x128xf32> -> vector<8x128xf32>
    %165 = arith.addf %162, %164 : vector<8x128xf32>
    %166 = math.tanh %165 : vector<8x128xf32>
    %cst_48 = arith.constant 1.000000e+00 : f32
    %167 = vector.broadcast %cst_48 : f32 to vector<8x128xf32>
    %168 = arith.subf %167, %153 : vector<8x128xf32>
    %169 = arith.mulf %168, %137 : vector<8x128xf32>
    %170 = arith.mulf %153, %166 : vector<8x128xf32>
    %171 = arith.addf %169, %170 : vector<8x128xf32>
    %172 = arith.index_cast %c4_i32 : i32 to index
    %c0_49 = arith.constant 0 : index
    %c0_50 = arith.constant 0 : index
    %173 = vector.load %arg5[%172, %c0_49, %c0_50] : memref<8x8x128xf32, #tpu.memory_space<vmem>>, vector<1x8x128xf32>
    %174 = vector.shape_cast %173 : vector<1x8x128xf32> to vector<8x128xf32>
    %175 = vector.shape_cast %171 : vector<8x128xf32> to vector<1x8x128xf32>
    tpu.vector_store %arg5[%172, %c0_49, %c0_50], %175 {strides = array<i32>} : memref<8x8x128xf32, #tpu.memory_space<vmem>>, vector<1x8x128xf32>,
    %c5_i32 = arith.constant 5 : i32
    %176 = arith.index_cast %c5_i32 : i32 to index
    %c0_51 = arith.constant 0 : index
    %c0_52 = arith.constant 0 : index
    %177 = vector.load %arg1[%176, %c0_51, %c0_52] : memref<8x8x384xf32, #tpu.memory_space<vmem>>, vector<1x8x384xf32>
    %178 = vector.shape_cast %177 : vector<1x8x384xf32> to vector<8x384xf32>
    %cst_53 = arith.constant dense<0.000000e+00> : vector<8x256xf32>
    %179 = tpu.matmul %171, %3, %cst_53 {dimension_numbers = #tpu.dot_dimension_numbers<[1], [0], [0], [1], [0, 0, 1, 1], [], []>} : vector<8x128xf32>, vector<128x256xf32>, vector<8x256xf32> -> vector<8x256xf32>
    %180 = vector.extract_strided_slice %178 {offsets = [0, 0], sizes = [8, 128], strides = [1, 1]} : vector<8x384xf32> to vector<8x128xf32>
    %181 = vector.extract_strided_slice %179 {offsets = [0, 0], sizes = [8, 128], strides = [1, 1]} : vector<8x256xf32> to vector<8x128xf32>
    %182 = arith.addf %180, %181 : vector<8x128xf32>
    %183 = arith.negf %182 : vector<8x128xf32>
    %184 = math.exp %183 : vector<8x128xf32>
    %cst_54 = arith.constant 1.000000e+00 : f32
    %185 = vector.broadcast %cst_54 : f32 to vector<8x128xf32>
    %186 = arith.addf %185, %184 : vector<8x128xf32>
    %187 = arith.divf %185, %186 : vector<8x128xf32>
    %188 = vector.extract_strided_slice %178 {offsets = [0, 128], sizes = [8, 128], strides = [1, 1]} : vector<8x384xf32> to vector<8x128xf32>
    %189 = vector.extract_strided_slice %179 {offsets = [0, 128], sizes = [8, 128], strides = [1, 1]} : vector<8x256xf32> to vector<8x128xf32>
    %190 = arith.addf %188, %189 : vector<8x128xf32>
    %191 = arith.negf %190 : vector<8x128xf32>
    %192 = math.exp %191 : vector<8x128xf32>
    %cst_55 = arith.constant 1.000000e+00 : f32
    %193 = vector.broadcast %cst_55 : f32 to vector<8x128xf32>
    %194 = arith.addf %193, %192 : vector<8x128xf32>
    %195 = arith.divf %193, %194 : vector<8x128xf32>
    %196 = vector.extract_strided_slice %178 {offsets = [0, 256], sizes = [8, 128], strides = [1, 1]} : vector<8x384xf32> to vector<8x128xf32>
    %197 = arith.mulf %195, %171 : vector<8x128xf32>
    %cst_56 = arith.constant dense<0.000000e+00> : vector<8x128xf32>
    %198 = tpu.matmul %197, %4, %cst_56 {dimension_numbers = #tpu.dot_dimension_numbers<[1], [0], [0], [1], [0, 0, 1, 1], [], []>} : vector<8x128xf32>, vector<128x128xf32>, vector<8x128xf32> -> vector<8x128xf32>
    %199 = arith.addf %196, %198 : vector<8x128xf32>
    %200 = math.tanh %199 : vector<8x128xf32>
    %cst_57 = arith.constant 1.000000e+00 : f32
    %201 = vector.broadcast %cst_57 : f32 to vector<8x128xf32>
    %202 = arith.subf %201, %187 : vector<8x128xf32>
    %203 = arith.mulf %202, %171 : vector<8x128xf32>
    %204 = arith.mulf %187, %200 : vector<8x128xf32>
    %205 = arith.addf %203, %204 : vector<8x128xf32>
    %206 = arith.index_cast %c5_i32 : i32 to index
    %c0_58 = arith.constant 0 : index
    %c0_59 = arith.constant 0 : index
    %207 = vector.load %arg5[%206, %c0_58, %c0_59] : memref<8x8x128xf32, #tpu.memory_space<vmem>>, vector<1x8x128xf32>
    %208 = vector.shape_cast %207 : vector<1x8x128xf32> to vector<8x128xf32>
    %209 = vector.shape_cast %205 : vector<8x128xf32> to vector<1x8x128xf32>
    tpu.vector_store %arg5[%206, %c0_58, %c0_59], %209 {strides = array<i32>} : memref<8x8x128xf32, #tpu.memory_space<vmem>>, vector<1x8x128xf32>,
    %c6_i32 = arith.constant 6 : i32
    %210 = arith.index_cast %c6_i32 : i32 to index
    %c0_60 = arith.constant 0 : index
    %c0_61 = arith.constant 0 : index
    %211 = vector.load %arg1[%210, %c0_60, %c0_61] : memref<8x8x384xf32, #tpu.memory_space<vmem>>, vector<1x8x384xf32>
    %212 = vector.shape_cast %211 : vector<1x8x384xf32> to vector<8x384xf32>
    %cst_62 = arith.constant dense<0.000000e+00> : vector<8x256xf32>
    %213 = tpu.matmul %205, %3, %cst_62 {dimension_numbers = #tpu.dot_dimension_numbers<[1], [0], [0], [1], [0, 0, 1, 1], [], []>} : vector<8x128xf32>, vector<128x256xf32>, vector<8x256xf32> -> vector<8x256xf32>
    %214 = vector.extract_strided_slice %212 {offsets = [0, 0], sizes = [8, 128], strides = [1, 1]} : vector<8x384xf32> to vector<8x128xf32>
    %215 = vector.extract_strided_slice %213 {offsets = [0, 0], sizes = [8, 128], strides = [1, 1]} : vector<8x256xf32> to vector<8x128xf32>
    %216 = arith.addf %214, %215 : vector<8x128xf32>
    %217 = arith.negf %216 : vector<8x128xf32>
    %218 = math.exp %217 : vector<8x128xf32>
    %cst_63 = arith.constant 1.000000e+00 : f32
    %219 = vector.broadcast %cst_63 : f32 to vector<8x128xf32>
    %220 = arith.addf %219, %218 : vector<8x128xf32>
    %221 = arith.divf %219, %220 : vector<8x128xf32>
    %222 = vector.extract_strided_slice %212 {offsets = [0, 128], sizes = [8, 128], strides = [1, 1]} : vector<8x384xf32> to vector<8x128xf32>
    %223 = vector.extract_strided_slice %213 {offsets = [0, 128], sizes = [8, 128], strides = [1, 1]} : vector<8x256xf32> to vector<8x128xf32>
    %224 = arith.addf %222, %223 : vector<8x128xf32>
    %225 = arith.negf %224 : vector<8x128xf32>
    %226 = math.exp %225 : vector<8x128xf32>
    %cst_64 = arith.constant 1.000000e+00 : f32
    %227 = vector.broadcast %cst_64 : f32 to vector<8x128xf32>
    %228 = arith.addf %227, %226 : vector<8x128xf32>
    %229 = arith.divf %227, %228 : vector<8x128xf32>
    %230 = vector.extract_strided_slice %212 {offsets = [0, 256], sizes = [8, 128], strides = [1, 1]} : vector<8x384xf32> to vector<8x128xf32>
    %231 = arith.mulf %229, %205 : vector<8x128xf32>
    %cst_65 = arith.constant dense<0.000000e+00> : vector<8x128xf32>
    %232 = tpu.matmul %231, %4, %cst_65 {dimension_numbers = #tpu.dot_dimension_numbers<[1], [0], [0], [1], [0, 0, 1, 1], [], []>} : vector<8x128xf32>, vector<128x128xf32>, vector<8x128xf32> -> vector<8x128xf32>
    %233 = arith.addf %230, %232 : vector<8x128xf32>
    %234 = math.tanh %233 : vector<8x128xf32>
    %cst_66 = arith.constant 1.000000e+00 : f32
    %235 = vector.broadcast %cst_66 : f32 to vector<8x128xf32>
    %236 = arith.subf %235, %221 : vector<8x128xf32>
    %237 = arith.mulf %236, %205 : vector<8x128xf32>
    %238 = arith.mulf %221, %234 : vector<8x128xf32>
    %239 = arith.addf %237, %238 : vector<8x128xf32>
    %240 = arith.index_cast %c6_i32 : i32 to index
    %c0_67 = arith.constant 0 : index
    %c0_68 = arith.constant 0 : index
    %241 = vector.load %arg5[%240, %c0_67, %c0_68] : memref<8x8x128xf32, #tpu.memory_space<vmem>>, vector<1x8x128xf32>
    %242 = vector.shape_cast %241 : vector<1x8x128xf32> to vector<8x128xf32>
    %243 = vector.shape_cast %239 : vector<8x128xf32> to vector<1x8x128xf32>
    tpu.vector_store %arg5[%240, %c0_67, %c0_68], %243 {strides = array<i32>} : memref<8x8x128xf32, #tpu.memory_space<vmem>>, vector<1x8x128xf32>,
    %c7_i32 = arith.constant 7 : i32
    %244 = arith.index_cast %c7_i32 : i32 to index
    %c0_69 = arith.constant 0 : index
    %c0_70 = arith.constant 0 : index
    %245 = vector.load %arg1[%244, %c0_69, %c0_70] : memref<8x8x384xf32, #tpu.memory_space<vmem>>, vector<1x8x384xf32>
    %246 = vector.shape_cast %245 : vector<1x8x384xf32> to vector<8x384xf32>
    %cst_71 = arith.constant dense<0.000000e+00> : vector<8x256xf32>
    %247 = tpu.matmul %239, %3, %cst_71 {dimension_numbers = #tpu.dot_dimension_numbers<[1], [0], [0], [1], [0, 0, 1, 1], [], []>} : vector<8x128xf32>, vector<128x256xf32>, vector<8x256xf32> -> vector<8x256xf32>
    %248 = vector.extract_strided_slice %246 {offsets = [0, 0], sizes = [8, 128], strides = [1, 1]} : vector<8x384xf32> to vector<8x128xf32>
    %249 = vector.extract_strided_slice %247 {offsets = [0, 0], sizes = [8, 128], strides = [1, 1]} : vector<8x256xf32> to vector<8x128xf32>
    %250 = arith.addf %248, %249 : vector<8x128xf32>
    %251 = arith.negf %250 : vector<8x128xf32>
    %252 = math.exp %251 : vector<8x128xf32>
    %cst_72 = arith.constant 1.000000e+00 : f32
    %253 = vector.broadcast %cst_72 : f32 to vector<8x128xf32>
    %254 = arith.addf %253, %252 : vector<8x128xf32>
    %255 = arith.divf %253, %254 : vector<8x128xf32>
    %256 = vector.extract_strided_slice %246 {offsets = [0, 128], sizes = [8, 128], strides = [1, 1]} : vector<8x384xf32> to vector<8x128xf32>
    %257 = vector.extract_strided_slice %247 {offsets = [0, 128], sizes = [8, 128], strides = [1, 1]} : vector<8x256xf32> to vector<8x128xf32>
    %258 = arith.addf %256, %257 : vector<8x128xf32>
    %259 = arith.negf %258 : vector<8x128xf32>
    %260 = math.exp %259 : vector<8x128xf32>
    %cst_73 = arith.constant 1.000000e+00 : f32
    %261 = vector.broadcast %cst_73 : f32 to vector<8x128xf32>
    %262 = arith.addf %261, %260 : vector<8x128xf32>
    %263 = arith.divf %261, %262 : vector<8x128xf32>
    %264 = vector.extract_strided_slice %246 {offsets = [0, 256], sizes = [8, 128], strides = [1, 1]} : vector<8x384xf32> to vector<8x128xf32>
    %265 = arith.mulf %263, %239 : vector<8x128xf32>
    %cst_74 = arith.constant dense<0.000000e+00> : vector<8x128xf32>
    %266 = tpu.matmul %265, %4, %cst_74 {dimension_numbers = #tpu.dot_dimension_numbers<[1], [0], [0], [1], [0, 0, 1, 1], [], []>} : vector<8x128xf32>, vector<128x128xf32>, vector<8x128xf32> -> vector<8x128xf32>
    %267 = arith.addf %264, %266 : vector<8x128xf32>
    %268 = math.tanh %267 : vector<8x128xf32>
    %cst_75 = arith.constant 1.000000e+00 : f32
    %269 = vector.broadcast %cst_75 : f32 to vector<8x128xf32>
    %270 = arith.subf %269, %255 : vector<8x128xf32>
    %271 = arith.mulf %270, %239 : vector<8x128xf32>
    %272 = arith.mulf %255, %268 : vector<8x128xf32>
    %273 = arith.addf %271, %272 : vector<8x128xf32>
    %274 = arith.index_cast %c7_i32 : i32 to index
    %c0_76 = arith.constant 0 : index
    %c0_77 = arith.constant 0 : index
    %275 = vector.load %arg5[%274, %c0_76, %c0_77] : memref<8x8x128xf32, #tpu.memory_space<vmem>>, vector<1x8x128xf32>
    %276 = vector.shape_cast %275 : vector<1x8x128xf32> to vector<8x128xf32>
    %277 = vector.shape_cast %273 : vector<8x128xf32> to vector<1x8x128xf32>
    tpu.vector_store %arg5[%274, %c0_76, %c0_77], %277 {strides = array<i32>} : memref<8x8x128xf32, #tpu.memory_space<vmem>>, vector<1x8x128xf32>,
    %c8_i32 = arith.constant 8 : i32
    %c0_78 = arith.constant 0 : index
    %c0_79 = arith.constant 0 : index
    %278 = vector.load %arg6[%c0_78, %c0_79] : memref<8x128xf32, #tpu.memory_space<vmem>>, vector<8x128xf32>
    tpu.vector_store %arg6[%c0_78, %c0_79], %273 {strides = array<i32>} : memref<8x128xf32, #tpu.memory_space<vmem>>, vector<8x128xf32>,
    return
  }
  func.func @transform_0(%arg0: i32) -> (i32, i32, i32) {
    %c0_i32 = arith.constant 0 : i32
    %c0_i32_0 = arith.constant 0 : i32
    %c0_i32_1 = arith.constant 0 : i32
    return %arg0, %c0_i32, %c0_i32_0 : i32, i32, i32
  }
  func.func @transform_1(%arg0: i32) -> (i32, i32) {
    %c0_i32 = arith.constant 0 : i32
    %c0_i32_0 = arith.constant 0 : i32
    %c0_i32_1 = arith.constant 0 : i32
    return %c0_i32, %c0_i32_0 : i32, i32
  }
  func.func @transform_2(%arg0: i32) -> (i32, i32) {
    %c0_i32 = arith.constant 0 : i32
    %c0_i32_0 = arith.constant 0 : i32
    %c0_i32_1 = arith.constant 0 : i32
    return %c0_i32, %c0_i32_0 : i32, i32
  }
  func.func @transform_3(%arg0: i32) -> (i32, i32) {
    %c0_i32 = arith.constant 0 : i32
    %c0_i32_0 = arith.constant 0 : i32
    %c0_i32_1 = arith.constant 0 : i32
    return %c0_i32, %c0_i32_0 : i32, i32
  }
  func.func @transform_4(%arg0: i32) -> (i32, i32, i32) {
    %c0_i32 = arith.constant 0 : i32
    %c0_i32_0 = arith.constant 0 : i32
    %c0_i32_1 = arith.constant 0 : i32
    return %arg0, %c0_i32, %c0_i32_0 : i32, i32, i32
  }
}

</mosaic_0001>

<bundles_post_ra>
// kernel: tpu_custom_call.1
= control target key start
LH: loop header
LB: loop body
LE: loop exit
PB: predicated region body
PF: predicated region fallthrough
CT: control target
= control target key end

     0   :  { %9 = vsyncpa [#allocation4], 0  ;;  %s3760_s0 = inlined_call_operand.hbm [shape: f32[24,8,384], index: 0, kind: input, shape index: {}]   ;;  %s3761_s1 = inlined_call_operand.hbm [shape: f32[8,128], index: 1, kind: input, shape index: {}]   ;;  %s3762_s2 = inlined_call_operand.hbm [shape: f32[128,256], index: 2, kind: input, shape index: {}]   ;;  %s3763_s3 = inlined_call_operand.hbm [shape: f32[128,128], index: 3, kind: input, shape index: {}]   ;;  %s3764_s4 = inlined_call_operand.hbm [shape: f32[24,8,128], index: 4, kind: output, shape index: {}]  }
   0x1   :  { %11 = vsyncpa [#allocation4 + $0x1], 0 }
   0x2   :  { %12 = vsyncpa [#allocation7], 0 }
   0x3   :  { %13 = vsyncpa [#allocation10], 0 }
   0x4   :  { %14 = vsyncpa [#allocation5], 0 }
   0x5   :  { %16 = vsyncpa [#allocation5 + $0x1], 0  ;;  %s3106_s15 = smov 0   ;;  %s3108_s16 = smov 0  }
   0x6   :  { %s3110_s17 = smov 0   ;;  %s3112_s18 = smov 0  }
   0x7 LB: > { %s3127_s19 = sadd.s32 4294967295, %s3063_s18   ;;  %s1775_s20 = sadd.s32 4294967294, %s3063_s18   ;;  %s3063_s18 = sphi %s3112_s18, %s3787_s18   ;;  %s3059_s17 = sphi %s3110_s17, %s3786_s17   ;;  %s3055_s16 = sphi %s3108_s16, %s3785_s16   ;;  %s3051_s15 = sphi %s3106_s15, %s3784_s15  }
   0x8   : > { %p42_p0 = scmp.ne.s32.totalorder %s3055_s16, %s3051_s15  ;;  %p3765_p1 = scmp.eq.s32.totalorder %s3127_s19, 0 }
   0x9   : > { %p135_p3 = scmp.eq.s32.totalorder %s1775_s20, 2  ;;  %p1776_p5 = scmp.ge.s32.totalorder %s3063_s18, 1 }
   0xa   : > { %p3136_p4 = por %p3765_p1, %p42_p0  ;;  %p142_p7 = scmp.lt.s32.totalorder %s3063_s18, 4 }
   0xb   : > { %p3141_p6 = por %p135_p3, %p42_p0  ;;  %s3065_s24 = smov [#allocation6]  }
   0xc   : > { %s3768_s21 = scalar_select %p3136_p4, 1, 0 }
   0xd   : > { %s3769_s22 = scalar_select %p3141_p6, 1, 0 }
   0xe   : > { %p3147_p9 = pnand %p1776_p5, %p142_p7  ;;  %s155_s25 = sshll.u32 %s3065_s24, 4  ;;  %s156_s25 = int_to_ptr.vmem [resolvable:$true] %s155_s25 }
   0xf   : > { %s3066_s26 = smov [#allocation8]   ;;  %s3067_s29 = smov [#allocation9]  }
  0x10   : > { %s3770_s23 = scalar_select %p3147_p9, 1, 0 }
  0x11   : > { %p2723_p10 = pneg %p3147_p9  ;;  %s165_s27 = sshll.u32 %s3066_s26, 4  ;;  %s3159_s27 = int_to_ptr.vmem [resolvable:$true] %s165_s27 }
  0x12   : > { %s3161_s30 = sshll.u32 %s3067_s29, 4  ;;  %s2875_s7 = scalar_lea.hbm %s3761_s1, 128  ;;  %s179_s30 = int_to_ptr.vmem [resolvable:$true] %s3161_s30 }
  0x13   : > { %p3155_p11 = pnand %p2723_p10, %p3765_p1  ;;  %p2876_p12 = scmp.ne.s32.totalorder %s3761_s1, %s2875_s7 }
  0x14   : > { %p2882_p5 = scmp.lt.u32.totalorder %s2875_s7, %s3761_s1 }
  0x15   : > { %p3171_p13 = pneg %p3155_p11 }
  0x17   : > { %p2878_p0 = pnand %p3171_p13, %p2876_p12 }
  0x19   : > { %p2879_p3 = pneg %p2878_p0 }
  0x1b   : > { %p2884_p7 = pnand %p2882_p5, %p2879_p3 }
  0x1d   : > { %2887 = shalt.err (!%p2884_p7)
}
  0x1e   : > { %s2888_s13 = scalar_lea.vmem %s156_s25, 128  ;;  %p2896_p2 = scmp.lt.s32.totalorder %s156_s25, %s156_s25 }
  0x1f   : > { %p2889_p10 = scmp.ne.s32.totalorder %s156_s25, %s2888_s13  ;;  %p2897_p6 = scmp.lt.s32.totalorder %s2888_s13, %s2888_s13 }
  0x21   : > { %p2891_p8 = pnand %p2889_p10, %p3171_p13  ;;  %p2898_p4 = por %p2897_p6, %p2896_p2 }
  0x23   : > { %p2892_p1 = pneg %p2891_p8 }
  0x25   : > { %p2899_p9 = pnand %p2898_p4, %p2892_p1 }
  0x27   : > { %2902 = shalt.err (!%p2899_p9)
}
  0x28   : > { %2726 = dma.hbm_to_vmem [thread:$0]  (!%p3155_p11), %s3761_s1, 128, %s156_s25, [#allocation7]  }
  0x29   : > { %s2903_s29 = scalar_lea.hbm %s3762_s2, 4096 }
  0x2a   : > { %p2904_p8 = scmp.ne.s32.totalorder %s3762_s2, %s2903_s29  ;;  %p2910_p1 = scmp.lt.u32.totalorder %s2903_s29, %s3762_s2 }
  0x2c   : > { %p2906_p12 = pnand %p2904_p8, %p3171_p13 }
  0x2e   : > { %p2907_p2 = pneg %p2906_p12 }
  0x30   : > { %p2912_p4 = pnand %p2910_p1, %p2907_p2 }
  0x32   : > { %2915 = shalt.err (!%p2912_p4)
}
  0x33   : > { %s2916_s25 = scalar_lea.vmem %s3159_s27, 4096  ;;  %p2924_p3 = scmp.lt.s32.totalorder %s3159_s27, %s3159_s27 }
  0x34   : > { %p2917_p6 = scmp.ne.s32.totalorder %s3159_s27, %s2916_s25  ;;  %p2925_p5 = scmp.lt.s32.totalorder %s2916_s25, %s2916_s25 }
  0x36   : > { %p2919_p9 = pnand %p2917_p6, %p3171_p13  ;;  %p2926_p7 = por %p2925_p5, %p2924_p3 }
  0x38   : > { %p2920_p0 = pneg %p2919_p9 }
  0x3a   : > { %p2927_p10 = pnand %p2926_p7, %p2920_p0 }
  0x3c   : > { %2930 = shalt.err (!%p2927_p10)
}
  0x3d   : > { %s3068_s9 = smov 256   ;;  %s3069_s11 = smov 16  }
  0x3e   : > { %2729 = dma.hbm_to_vmem [thread:$0]  (!%p3155_p11), %s3762_s2, 4096, %s3159_s27, [#allocation7], %s3068_s9, %s3068_s9, %s3069_s11  }
  0x3f   : > { %s2931_s24 = scalar_lea.hbm %s3763_s3, 2048 }
  0x40   : > { %p2932_p8 = scmp.ne.s32.totalorder %s3763_s3, %s2931_s24  ;;  %p2938_p1 = scmp.lt.u32.totalorder %s2931_s24, %s3763_s3 }
  0x42   : > { %p2934_p12 = pnand %p2932_p8, %p3171_p13 }
  0x44   : > { %p2935_p2 = pneg %p2934_p12 }
  0x46   : > { %p2940_p4 = pnand %p2938_p1, %p2935_p2 }
  0x48   : > { %2943 = shalt.err (!%p2940_p4)
}
  0x49   : > { %s2944_s7 = scalar_lea.vmem %s179_s30, 2048  ;;  %p2952_p3 = scmp.lt.s32.totalorder %s179_s30, %s179_s30 }
  0x4a   : > { %p2945_p6 = scmp.ne.s32.totalorder %s179_s30, %s2944_s7  ;;  %p2953_p5 = scmp.lt.s32.totalorder %s2944_s7, %s2944_s7 }
  0x4c   : > { %p2947_p9 = pnand %p2945_p6, %p3171_p13  ;;  %p2954_p7 = por %p2953_p5, %p2952_p3 }
  0x4e   : > { %p2948_p0 = pneg %p2947_p9 }
  0x50   : > { %p2955_p10 = pnand %p2954_p7, %p2948_p0 }
  0x52   : > { %2958 = shalt.err (!%p2955_p10)
}
  0x53   : > { %s3070_s27 = smov 128   ;;  %s3071_s10 = smov 8  }
  0x54   : > { %2732 = dma.hbm_to_vmem [thread:$0]  (!%p3155_p11), %s3763_s3, 2048, %s179_s30, [#allocation10], %s3070_s27, %s3070_s27, %s3071_s10  }
  0x55   : > { %s3230_s9 = sadd.s32 1, %s3063_s18   ;;  %s29_s12 = sadd.s32 1, %s3059_s17 }
  0x56   : > { %s26_s11 = ssub.s32 %s3063_s18, %s3230_s9  ;;  %p36_p8 = scmp.ne.s32.totalorder %s3059_s17, %s3055_s16 }
  0x57   : > { %p27_p13 = scmp.eq.s32.totalorder %s26_s11, 0  ;;  %p37_p12 = scmp.eq.s32.totalorder %s3063_s18, 0 }
  0x58   : > { %p2744_p2 = scmp.lt.s32.totalorder %s3063_s18, 3  ;;  %p3773_p4 = scmp.eq.s32.totalorder %s3127_s19, 2 }
  0x59   : > { %s3240_s13 = scalar_select %p27_p13, %s3059_s17, %s29_s12  }
  0x5a   : > { %p38_p1 = por %p37_p12, %p36_p8  ;;  %p3244_p6 = por %p3773_p4, %p36_p8 }
  0x5b   : > { %s192_s28 = sand.u32 1, %s3059_s17   ;;  %s2705_s20 = smul.u32 3072, %s3063_s18 }
  0x5c   : > { %s2704_s30 = smul.u32 192, %s192_s28  ;;  %p3255_p11 = pnand %p2744_p2, %p38_p1 }
  0x5d   : > { %s3253_s29 = scalar_lea.hbm %s3760_s0, %s2705_s20  ;;  %s3261_s27 = scalar_lea.sflag [#allocation4], %s192_s28 }
  0x5e   : > { %s196_s6 = scalar_lea.vmem [#allocation3], %s2704_s30  ;;  %s2959_s10 = scalar_lea.hbm %s3253_s29, 3072 }
  0x5f   : > { %s204_s7 = sshll.u32 %s196_s6, 4  ;;  %p2960_p9 = scmp.ne.s32.totalorder %s3253_s29, %s2959_s10  ;;  %s3259_s7 = int_to_ptr.vmem [resolvable:$true] %s204_s7 }
  0x60   : > { %p2961_p0 = pneg %p3255_p11  ;;  %s2964_s11 = scalar_lea.hbm %s3760_s0, 9216 }
  0x61   : > { %p2965_p7 = scmp.lt.u32.totalorder %s3253_s29, %s3760_s0  ;;  %p2966_p10 = scmp.lt.u32.totalorder %s2964_s11, %s2959_s10 }
  0x62   : > { %p2962_p3 = pnand %p2961_p0, %p2960_p9  ;;  %p2968_p8 = scmp.lt.u32.totalorder %s2959_s10, %s3253_s29 }
  0x63   : > { %p2967_p13 = por %p2966_p10, %p2965_p7 }
  0x64   : > { %p2963_p5 = pneg %p2962_p3 }
  0x65   : > { %p2969_p12 = por %p2968_p8, %p2967_p13 }
  0x67   : > { %p2970_p2 = pnand %p2969_p12, %p2963_p5 }
  0x69   : > { %2973 = shalt.err (!%p2970_p2)
}
  0x6a   : > { %s2974_s28 = scalar_lea.vmem %s3259_s7, 3072  ;;  %s3072_s30 = smov [#allocation3]  }
  0x6b   : > { %p2975_p1 = scmp.ne.s32.totalorder %s3259_s7, %s2974_s28  ;;  %s2979_s24 = sshll.u32 %s3072_s30, 4  ;;  %s2980_s24 = int_to_ptr.vmem [resolvable:$false] %s2979_s24 }
  0x6c   : > { %s2981_s26 = scalar_lea.vmem %s2980_s24, 6144  ;;  %p2982_p3 = scmp.lt.s32.totalorder %s3259_s7, %s2980_s24 }
  0x6d   : > { %p2977_p4 = pnand %p2975_p1, %p2961_p0  ;;  %p2983_p7 = scmp.lt.s32.totalorder %s2981_s26, %s2974_s28 }
  0x6f   : > { %p2978_p9 = pneg %p2977_p4  ;;  %p2984_p10 = por %p2983_p7, %p2982_p3 }
  0x71   : > { %p2985_p13 = pnand %p2984_p10, %p2978_p9 }
  0x73   : > { %2988 = shalt.err (!%p2985_p13)
}
  0x74   : > { %s3073_s6 = smov 384   ;;  %s3074_s10 = smov 24  }
  0x75   : > { %2736 = dma.hbm_to_vmem [thread:$0]  (!%p3255_p11), %s3253_s29, 3072, %s3259_s7, %s3261_s27, %s3073_s6, %s3073_s6, %s3074_s10  }
  0x76   : > { %p3776_p0 = scmp.ne.s32.totalorder %s3770_s23, 0 }
  0x77   : > { %s3292_s8 = sand.u32 (!%p3776_p0), 1, %s3055_s16   ;;  %p3777_p5 = scmp.ne.s32.totalorder (!%p3776_p0), %s3768_s21, 0 }
  0x78   : > { %216 = sbr.rel (%p3776_p0) target bundleno = 3970 (0xf82), region = 36  ;;  %s219_s11 = scalar_lea.sflag (!%p3776_p0), [#allocation4], %s3292_s8 }
  0x79   : > { %s2706_s25 = smul.u32 (!%p3776_p0), 192, %s3292_s8 }
  0x7b   : > { %s3296_s12 = scalar_lea.vmem (!%p3776_p0), [#allocation3], %s2706_s25 }
  0x7f   : > { %3034 = dma.done.wait (%p3777_p5), %s219_s11, 3072  }
  0x80   : > { %3036 = vsyncadd (%p3777_p5), %s219_s11, 4294964224  ;;  %p3778_p11 = scmp.eq.s32.totalorder %s3127_s19, 0 }
  0x82   : > { %3038 = dma.done.wait (%p3778_p11), [#allocation7], 4224   ;;  %p3779_p8 = pmov %p3778_p11 }
  0x84   : > { %3040 = vsyncadd (%p3779_p8), [#allocation7], 4294963072  ;;  %p3780_p12 = pmov %p3779_p8 }
  0x85   : > { %p3781_p2 = pmov %p3779_p8 }
  0x86   : > { %3042 = dma.done.wait (%p3780_p12), [#allocation10], 2048  }
  0x87   : > { %3044 = vsyncadd (%p3781_p2), [#allocation10], 4294965248  ;;  %s1788_s23 = sshll.u32 %s3292_s8, 6  ;;  %p3782_p1 = scmp.ne.s32.totalorder %s3127_s19, 0 }
  0x88   : > { %s3311_s29 = scalar_lea.vmem [#allocation11], %s1788_s23  ;;  %v265_v0 = vld [vmem:[#allocation6] sm:$0xff] (!%p3782_p1) }
  0x89   : > { %264 = sbr.rel (%p3782_p1) target bundleno = 144 (0x90), region = 56  ;;  %266 = vst [vmem:[#allocation2] sm:$0xff] (!%p3782_p1), %v265_v0 }
  0x90 PF: > { %v268_v1 = vld [vmem:[#allocation8 + $0x8] sm:$0xff]  ;;  %v270_v2 = vld [vmem:[#allocation8 + $0x18] sm:$0xff]  ;;  %v267_v3 = vld [vmem:[#allocation8] sm:$0xff]  ;;  %v3075_v8 = vmov 0.0   ;;  %v3076_v54 = vmov 0.0|0.0   ;;  %vm3077_vm0 = vmmov 0  }
  0x91   : > { %v3315_v4 = vpack.c.bf16 %v270_v2, %v268_v1  ;;  %v269_v5 = vld [vmem:[#allocation8 + $0x10] sm:$0xff]  ;;  %v272_v6 = vld [vmem:[#allocation8 + $0x28] sm:$0xff]  ;;  %v274_v7 = vld [vmem:[#allocation8 + $0x38] sm:$0xff]  ;;  %383 = vmatprep.mubr.f32.mxu0 %v3075_v8  ;;  %2288 = vmatprep.subr.bf16.mxu1 %v3076_v54  ;;  %s1839_s21 = sshll.u32 %s3127_s19, 10  ;;  %s1673_s5 = sshll.u32 %s3311_s29, 4  ;;  %s3716_s5 = int_to_ptr.vmem [resolvable:$true] %s1673_s5 }
  0x92   : > { %v3318_v9 = vpack.c.bf16 %v269_v5, %v267_v3  ;;  %v3320_v10 = vpack.c.bf16 %v274_v7, %v272_v6  ;;  %v271_v11 = vld [vmem:[#allocation8 + $0x20] sm:$0xff]  ;;  %v273_v12 = vld [vmem:[#allocation8 + $0x30] sm:$0xff]  ;;  %v276_v13 = vld [vmem:[#allocation8 + $0x48] sm:$0xff]  ;;  %2008 = vmatprep.mubr.msk.f32.mxu1 %vm3077_vm0, %v3075_v8  ;;  %s3714_s20 = scalar_lea.hbm %s3764_s4, %s1839_s21  ;;  %s1660_s28 = scalar_lea.sflag [#allocation5], %s3292_s8 }
  0x93   : > { %2257 = vmatprep.subr.bf16.mxu0 %v3315_v4  ;;  %v278_v14 = vld [vmem:[#allocation8 + $0x58] sm:$0xff]  ;;  %v3324_v15 = vpack.c.bf16 %v273_v12, %v271_v11  ;;  %v275_v17 = vld [vmem:[#allocation8 + $0x40] sm:$0xff]  ;;  %v277_v18 = vld [vmem:[#allocation8 + $0x50] sm:$0xff]  ;;  %s2989_s30 = scalar_lea.vmem %s3716_s5, 1024  ;;  %s3078_s19 = smov [#allocation11]  }
  0x94   : > { %2259 = vmatpush1.bf16.msra.mxu0 %v3318_v9  ;;  %v3327_v16 = vpack.c.bf16 %v278_v14, %v276_v13  ;;  %v280_v19 = vld [vmem:[#allocation8 + $0x68] sm:$0xff]  ;;  %v282_v20 = vld [vmem:[#allocation8 + $0x78] sm:$0xff]  ;;  %v3330_v21 = vpack.c.bf16 %v277_v18, %v275_v17  ;;  %v279_v23 = vld [vmem:[#allocation8 + $0x60] sm:$0xff]  ;;  %p2990_p4 = scmp.ne.s32.totalorder %s3716_s5, %s2989_s30  ;;  %s2993_s24 = sshll.u32 %s3078_s19, 4  ;;  %s2994_s24 = int_to_ptr.vmem [resolvable:$false] %s2993_s24 }
  0x95   : > { %2261 = vmatprep.subr.bf16.mxu0 %v3320_v10  ;;  %v3333_v22 = vpack.c.bf16 %v282_v20, %v280_v19  ;;  %v281_v24 = vld [vmem:[#allocation8 + $0x70] sm:$0xff]  ;;  %v284_v25 = vld [vmem:[#allocation8 + $0x88] sm:$0xff]  ;;  %v286_v26 = vld [vmem:[#allocation8 + $0x98] sm:$0xff]  ;;  %s2995_s26 = scalar_lea.vmem %s2994_s24, 2048  ;;  %p2996_p7 = scmp.lt.s32.totalorder %s3716_s5, %s2994_s24 }
  0x96   : > { %v3336_v27 = vpack.c.bf16 %v281_v24, %v279_v23  ;;  %v3339_v28 = vpack.c.bf16 %v286_v26, %v284_v25  ;;  %v283_v29 = vld [vmem:[#allocation8 + $0x80] sm:$0xff]  ;;  %v285_v30 = vld [vmem:[#allocation8 + $0x90] sm:$0xff]  ;;  %v288_v31 = vld [vmem:[#allocation8 + $0xa8] sm:$0xff]  ;;  %p2991_p9 = pnand %p2990_p4, %p3244_p6  ;;  %p2997_p10 = scmp.lt.s32.totalorder %s2995_s26, %s2989_s30 }
  0x97   : > { %v290_v32 = vld [vmem:[#allocation8 + $0xb8] sm:$0xff]  ;;  %v3342_v33 = vpack.c.bf16 %v285_v30, %v283_v29  ;;  %v287_v35 = vld [vmem:[#allocation8 + $0xa0] sm:$0xff]  ;;  %v289_v36 = vld [vmem:[#allocation8 + $0xb0] sm:$0xff] }
  0x98   : > { %2263 = vmatpush1.bf16.msra.mxu0 %v3324_v15  ;;  %v3345_v34 = vpack.c.bf16 %v290_v32, %v288_v31  ;;  %v292_v37 = vld [vmem:[#allocation8 + $0xc8] sm:$0xff]  ;;  %v294_v38 = vld [vmem:[#allocation8 + $0xd8] sm:$0xff]  ;;  %v3348_v39 = vpack.c.bf16 %v289_v36, %v287_v35  ;;  %v291_v41 = vld [vmem:[#allocation8 + $0xc0] sm:$0xff]  ;;  %p2992_p3 = pneg %p2991_p9  ;;  %p2998_p13 = por %p2997_p10, %p2996_p7 }
  0x99   : > { %2265 = vmatprep.subr.bf16.mxu0 %v3327_v16  ;;  %v3351_v40 = vpack.c.bf16 %v294_v38, %v292_v37  ;;  %v293_v42 = vld [vmem:[#allocation8 + $0xd0] sm:$0xff]  ;;  %v296_v43 = vld [vmem:[#allocation8 + $0xe8] sm:$0xff]  ;;  %v298_v44 = vld [vmem:[#allocation8 + $0xf8] sm:$0xff] }
  0x9a   : > { %v3354_v45 = vpack.c.bf16 %v293_v42, %v291_v41  ;;  %v3357_v46 = vpack.c.bf16 %v298_v44, %v296_v43  ;;  %v295_v47 = vld [vmem:[#allocation8 + $0xe0] sm:$0xff]  ;;  %v297_v48 = vld [vmem:[#allocation8 + $0xf0] sm:$0xff]  ;;  %v300_v52 = vld [vmem:[#allocation9 + $0x8] sm:$0xff]  ;;  %p2999_p0 = pnand %p2998_p13, %p2992_p3 }
  0x9b   : > { %v3360_v49 = vpack.c.bf16 %v297_v48, %v295_v47  ;;  %v3364_v50 = vld [vmem:[#allocation2] sm:$0xff]  ;;  %v299_v51 = vld [vmem:[#allocation9] sm:$0xff]  ;;  %v302_v56 = vld [vmem:[#allocation9 + $0x18] sm:$0xff] }
  0x9c   : > { %2267 = vmatpush1.bf16.msra.mxu0 %v3330_v21  ;;  %v3385_v53 = vpack.c.bf16 %v300_v52, %v299_v51  ;;  %v301_v55 = vld [vmem:[#allocation9 + $0x10] sm:$0xff]  ;;  %v303_v58 = vld [vmem:[#allocation9 + $0x20] sm:$0xff]  ;;  %v304_v59 = vld [vmem:[#allocation9 + $0x28] sm:$0xff] }
  0x9d   : > { %2269 = vmatprep.subr.bf16.mxu0 %v3333_v22  ;;  %v3390_v57 = vpack.c.bf16 %v302_v56, %v301_v55  ;;  %v3394_v60 = vpack.c.bf16 %v304_v59, %v303_v58  ;;  %v305_v61 = vld [vmem:[#allocation9 + $0x30] sm:$0xff]  ;;  %v306_v62 = vld [vmem:[#allocation9 + $0x38] sm:$0xff]  ;;  %v307_v0 = vld [vmem:[#allocation9 + $0x40] sm:$0xff] }
  0x9e   : > { %2290 = vmatpush3.bf16.msra.mxu1 %v3385_v53  ;;  %v3398_v63 = vpack.c.bf16 %v306_v62, %v305_v61  ;;  %v308_v1 = vld [vmem:[#allocation9 + $0x48] sm:$0xff]  ;;  %v309_v3 = vld [vmem:[#allocation9 + $0x50] sm:$0xff]  ;;  %v310_v5 = vld [vmem:[#allocation9 + $0x58] sm:$0xff] }
  0x9f   : > { %2291 = vmatprep.subr.bf16.mxu1 %v3076_v54  ;;  %v3402_v2 = vpack.c.bf16 %v308_v1, %v307_v0  ;;  %v3406_v6 = vpack.c.bf16 %v310_v5, %v309_v3  ;;  %v311_v7 = vld [vmem:[#allocation9 + $0x60] sm:$0xff]  ;;  %v312_v11 = vld [vmem:[#allocation9 + $0x68] sm:$0xff]  ;;  %v313_v13 = vld [vmem:[#allocation9 + $0x70] sm:$0xff] }
  0xa0   : > { %2271 = vmatpush1.bf16.msra.mxu0 %v3336_v27  ;;  %v3411_v12 = vpack.c.bf16 %v312_v11, %v311_v7  ;;  %v314_v14 = vld [vmem:[#allocation9 + $0x78] sm:$0xff]  ;;  %v317_v18 = vld [vmem:[%s3296_s12 + $0x8] sm:$0xff]  ;;  %v318_v38 = vld [vmem:[%s3296_s12 + $0x10] sm:$0xff] }
  0xa1   : > { %2273 = vmatprep.subr.bf16.mxu0 %v3339_v28  ;;  %v3415_v17 = vpack.c.bf16 %v314_v14, %v313_v13  ;;  %v316_v31 = vld [vmem:[%s3296_s12] sm:$0xff]  ;;  %v1792_v5 = vld [vmem:[%s3296_s12 + $0x18] sm:$0xff] }
  0xa2   : > { %2293 = vmatpush3.bf16.msra.mxu1 %v3390_v57 }
  0xa3   : > { %2294 = vmatprep.subr.bf16.mxu1 %v3076_v54 }
  0xa4   : > { %2275 = vmatpush1.bf16.msra.mxu0 %v3342_v33 }
  0xa5   : > { %2277 = vmatprep.subr.bf16.mxu0 %v3345_v34 }
  0xa6   : > { %2296 = vmatpush3.bf16.msra.mxu1 %v3394_v60 }
  0xa7   : > { %2297 = vmatprep.subr.bf16.mxu1 %v3076_v54 }
  0xa8   : > { %2279 = vmatpush1.bf16.msra.mxu0 %v3348_v39 }
  0xa9   : > { %2281 = vmatprep.subr.bf16.mxu0 %v3351_v40 }
  0xaa   : > { %2299 = vmatpush3.bf16.msra.mxu1 %v3398_v63 }
  0xab   : > { %2300 = vmatprep.subr.bf16.mxu1 %v3076_v54 }
  0xac   : > { %2283 = vmatpush1.bf16.msra.mxu0 %v3354_v45 }
  0xad   : > { %2285 = vmatprep.subr.bf16.mxu0 %v3357_v46 }
  0xae   : > { %2302 = vmatpush3.bf16.msra.mxu1 %v3402_v2 }
  0xaf   : > { %2303 = vmatprep.subr.bf16.mxu1 %v3076_v54 }
  0xb0   : > { %2287 = vmatpush1.bf16.msra.mxu0 %v3360_v49 }
  0xb1   : > { %2313 = vmatprep.subr.bf16.mxu0 %v3315_v4 }
  0xb2   : > { %2305 = vmatpush3.bf16.msra.mxu1 %v3406_v6 }
  0xb3   : > { %384 = vmatmul.mubr.f32.vlgmr.msra.gmra.mrb[0].mxu0 %v3364_v50  ;;  %2306 = vmatprep.subr.bf16.mxu1 %v3076_v54 }
  0xb4   : > { %2315 = vmatpush1.bf16.msra.mxu0 %v3318_v9  ;;  %550 = vmatprep.mubr.f32.mxu0 %v3075_v8 }
  0xb5   : > { %2317 = vmatprep.subr.bf16.mxu0 %v3320_v10 }
  0xb6   : > { %2308 = vmatpush3.bf16.msra.mxu1 %v3411_v12 }
  0xb7   : > { %2309 = vmatprep.subr.bf16.mxu1 %v3076_v54 }
  0xb8   : > { %2319 = vmatpush1.bf16.msra.mxu0 %v3324_v15 }
  0xb9   : > { %2321 = vmatprep.subr.bf16.mxu0 %v3327_v16 }
  0xba   : > { %2311 = vmatpush3.bf16.msra.mxu1 %v3415_v17 }
  0xbb   : > { %2344 = vmatprep.subr.bf16.mxu1 %v3076_v54 }
  0xbc   : > { %2323 = vmatpush1.bf16.msra.mxu0 %v3330_v21 }
  0xbd   : > { %2325 = vmatprep.subr.bf16.mxu0 %v3333_v22 }
  0xc0   : > { %2327 = vmatpush1.bf16.msra.mxu0 %v3336_v27 }
  0xc1   : > { %2329 = vmatprep.subr.bf16.mxu0 %v3339_v28 }
  0xc4   : > { %2331 = vmatpush1.bf16.msra.mxu0 %v3342_v33 }
  0xc5   : > { %2333 = vmatprep.subr.bf16.mxu0 %v3345_v34 }
  0xc8   : > { %2335 = vmatpush1.bf16.msra.mxu0 %v3348_v39 }
  0xc9   : > { %2337 = vmatprep.subr.bf16.mxu0 %v3351_v40 }
  0xcc   : > { %2339 = vmatpush1.bf16.msra.mxu0 %v3354_v45 }
  0xcd   : > { %2341 = vmatprep.subr.bf16.mxu0 %v3357_v46 }
  0xd0   : > { %2343 = vmatpush1.bf16.msra.mxu0 %v3360_v49 }
  0xd1   : > { %2369 = vmatprep.subr.bf16.mxu0 %v3315_v4 }
 0x186   : > { %v385_v19 = vpop.f32.mrb[0].mxu0 }
 0x187   : > { %v387_v20 = vpop.f32.mrb[1].mxu0  ;;  %v390_v32 = vadd.f32 %v385_v19, %v316_v31 }
 0x188   : > { %v397_v23 = vadd.f32 %v387_v20, %v317_v18  ;;  %v1794_v18 = vld [vmem:[%s3296_s12 + $0x28] sm:$0xff] }
 0x189   : > { %v1790_v35 = vmul.f32 -1.442695, %v390_v32  ;;  %v1799_v32 = vld [vmem:[%s3296_s12 + $0x38] sm:$0xff] }
 0x18a   : > { %v1791_v24 = vmul.f32 -1.442695, %v397_v23 }
 0x18c   : > { %2795 = vpow2.f32 %v1791_v24 }
 0x196   : > { %v2796_v25 = vpop.eup %2795 }
 0x197   : > { %v401_v26 = vadd.f32 1.0, %v2796_v25 }
 0x199   : > { %2797 = vrcp.f32 %v401_v26 }
 0x19a   : > { %2799 = vpow2.f32 %v1790_v35 }
 0x1a3   : > { %v2798_v29 = vpop.eup %2797 }
 0x1a4   : > { %v404_v30 = vmul.f32 %v2798_v29, %v3364_v50  ;;  %v2800_v36 = vpop.eup %2799 }
 0x1a5   : > { %v394_v37 = vadd.f32 1.0, %v2800_v36 }
 0x1a6   : > { %2009 = vmatmul.mubr.f32.vlgmr.msra.gmra.mrb[0].mxu1 %v404_v30 }
 0x1a7   : > { %2346 = vmatpush3.bf16.msra.mxu1 %v3385_v53  ;;  %2043 = vmatprep.mubr.msk.f32.mxu1 %vm3077_vm0, %v3075_v8  ;;  %2801 = vrcp.f32 %v394_v37 }
 0x1a8   : > { %2347 = vmatprep.subr.bf16.mxu1 %v3076_v54 }
 0x1ab   : > { %2349 = vmatpush3.bf16.msra.mxu1 %v3390_v57 }
 0x1ac   : > { %2350 = vmatprep.subr.bf16.mxu1 %v3076_v54 }
 0x1af   : > { %2352 = vmatpush3.bf16.msra.mxu1 %v3394_v60 }
 0x1b0   : > { %2353 = vmatprep.subr.bf16.mxu1 %v3076_v54 }
 0x1b1   : > { %v2802_v44 = vpop.eup %2801 }
 0x1b2   : > { %v477_v47 = vsub.f32 1.0, %v2802_v44 }
 0x1b3   : > { %2355 = vmatpush3.bf16.msra.mxu1 %v3398_v63 }
 0x1b4   : > { %2356 = vmatprep.subr.bf16.mxu1 %v3076_v54  ;;  %v478_v51 = vmul.f32 %v477_v47, %v3364_v50  ;;  %v1793_v50 = vld [vmem:[%s3296_s12 + $0x20] sm:$0xff]  ;;  %v1798_v47 = vld [vmem:[%s3296_s12 + $0x30] sm:$0xff] }
 0x1b7   : > { %2358 = vmatpush3.bf16.msra.mxu1 %v3402_v2 }
 0x1b8   : > { %2359 = vmatprep.subr.bf16.mxu1 %v3076_v54 }
 0x1bb   : > { %2361 = vmatpush3.bf16.msra.mxu1 %v3406_v6 }
 0x1bc   : > { %2362 = vmatprep.subr.bf16.mxu1 %v3076_v54 }
 0x1bf   : > { %2364 = vmatpush3.bf16.msra.mxu1 %v3411_v12 }
 0x1c0   : > { %2365 = vmatprep.subr.bf16.mxu1 %v3076_v54 }
 0x1c3   : > { %2367 = vmatpush3.bf16.msra.mxu1 %v3415_v17 }
 0x1c4   : > { %2400 = vmatprep.subr.bf16.mxu1 %v3076_v54 }
 0x279   : > { %v471_v41 = vpop.f32.mrb[0].mxu1 }
 0x27a   : > { %v475_v42 = vadd.f32 %v471_v41, %v318_v38  ;;  %v2010_v43 = vpop.f32.mrb[1].mxu1 }
 0x27c   : > { %2803 = vtanh.f32 %v475_v42 }
 0x286   : > { %v2804_v48 = vpop.eup %2803 }
 0x287   : > { %v479_v52 = vmul.f32 %v2804_v48, %v2802_v44 }
 0x289   : > { %v3443_v55 = vadd.f32 %v479_v52, %v478_v51 }
 0x28b   : > { %481 = vst [vmem:[%s3311_s29] sm:$0xff] %v3443_v55  ;;  %551 = vmatmul.mubr.f32.vlgmr.msra.gmra.mrb[2].mxu0 %v3443_v55 }
 0x28c   : > { %2371 = vmatpush1.bf16.msra.mxu0 %v3318_v9  ;;  %718 = vmatprep.mubr.f32.mxu0 %v3075_v8 }
 0x28d   : > { %2373 = vmatprep.subr.bf16.mxu0 %v3320_v10 }
 0x290   : > { %2375 = vmatpush1.bf16.msra.mxu0 %v3324_v15 }
 0x291   : > { %2377 = vmatprep.subr.bf16.mxu0 %v3327_v16 }
 0x294   : > { %2379 = vmatpush1.bf16.msra.mxu0 %v3330_v21 }
 0x295   : > { %2381 = vmatprep.subr.bf16.mxu0 %v3333_v22 }
 0x298   : > { %2383 = vmatpush1.bf16.msra.mxu0 %v3336_v27 }
 0x299   : > { %2385 = vmatprep.subr.bf16.mxu0 %v3339_v28 }
 0x29c   : > { %2387 = vmatpush1.bf16.msra.mxu0 %v3342_v33 }
 0x29d   : > { %2389 = vmatprep.subr.bf16.mxu0 %v3345_v34 }
 0x2a0   : > { %2391 = vmatpush1.bf16.msra.mxu0 %v3348_v39 }
 0x2a1   : > { %2393 = vmatprep.subr.bf16.mxu0 %v3351_v40 }
 0x2a4   : > { %2395 = vmatpush1.bf16.msra.mxu0 %v3354_v45 }
 0x2a5   : > { %2397 = vmatprep.subr.bf16.mxu0 %v3357_v46 }
 0x2a8   : > { %2399 = vmatpush1.bf16.msra.mxu0 %v3360_v49 }
 0x2a9   : > { %2425 = vmatprep.subr.bf16.mxu0 %v3315_v4 }
 0x35e   : > { %v552_v56 = vpop.f32.mrb[2].mxu0 }
 0x35f   : > { %v554_v58 = vpop.f32.mrb[3].mxu0  ;;  %v557_v7 = vadd.f32 %v1792_v5, %v552_v56 }
 0x360   : > { %v564_v59 = vadd.f32 %v1793_v50, %v554_v58  ;;  %v1800_v50 = vld [vmem:[%s3296_s12 + $0x40] sm:$0xff] }
 0x361   : > { %v1795_v11 = vmul.f32 -1.442695, %v557_v7  ;;  %v1805_v7 = vld [vmem:[%s3296_s12 + $0x50] sm:$0xff] }
 0x362   : > { %v1796_v61 = vmul.f32 -1.442695, %v564_v59 }
 0x364   : > { %2805 = vpow2.f32 %v1796_v61 }
 0x36e   : > { %v2806_v62 = vpop.eup %2805 }
 0x36f   : > { %v568_v0 = vadd.f32 1.0, %v2806_v62 }
 0x371   : > { %2807 = vrcp.f32 %v568_v0 }
 0x372   : > { %2809 = vpow2.f32 %v1795_v11 }
 0x37b   : > { %v2808_v1 = vpop.eup %2807 }
 0x37c   : > { %v571_v3 = vmul.f32 %v2808_v1, %v3443_v55  ;;  %v2810_v13 = vpop.eup %2809 }
 0x37d   : > { %v561_v14 = vadd.f32 1.0, %v2810_v13 }
 0x37e   : > { %2044 = vmatmul.mubr.f32.vlgmr.msra.gmra.mrb[2].mxu1 %v571_v3 }
 0x37f   : > { %2402 = vmatpush3.bf16.msra.mxu1 %v3385_v53  ;;  %2078 = vmatprep.mubr.msk.f32.mxu1 %vm3077_vm0, %v3075_v8  ;;  %2811 = vrcp.f32 %v561_v14 }
 0x380   : > { %2403 = vmatprep.subr.bf16.mxu1 %v3076_v54 }
 0x383   : > { %2405 = vmatpush3.bf16.msra.mxu1 %v3390_v57 }
 0x384   : > { %2406 = vmatprep.subr.bf16.mxu1 %v3076_v54 }
 0x387   : > { %2408 = vmatpush3.bf16.msra.mxu1 %v3394_v60 }
 0x388   : > { %2409 = vmatprep.subr.bf16.mxu1 %v3076_v54 }
 0x389   : > { %v2812_v24 = vpop.eup %2811 }
 0x38a   : > { %v644_v25 = vsub.f32 1.0, %v2812_v24 }
 0x38b   : > { %2411 = vmatpush3.bf16.msra.mxu1 %v3398_v63 }
 0x38c   : > { %2412 = vmatprep.subr.bf16.mxu1 %v3076_v54  ;;  %v645_v29 = vmul.f32 %v644_v25, %v3443_v55  ;;  %v1804_v25 = vld [vmem:[%s3296_s12 + $0x48] sm:$0xff] }
 0x38f   : > { %2414 = vmatpush3.bf16.msra.mxu1 %v3402_v2 }
 0x390   : > { %2415 = vmatprep.subr.bf16.mxu1 %v3076_v54 }
 0x393   : > { %2417 = vmatpush3.bf16.msra.mxu1 %v3406_v6 }
 0x394   : > { %2418 = vmatprep.subr.bf16.mxu1 %v3076_v54 }
 0x397   : > { %2420 = vmatpush3.bf16.msra.mxu1 %v3411_v12 }
 0x398   : > { %2421 = vmatprep.subr.bf16.mxu1 %v3076_v54 }
 0x39b   : > { %2423 = vmatpush3.bf16.msra.mxu1 %v3415_v17 }
 0x39c   : > { %2456 = vmatprep.subr.bf16.mxu1 %v3076_v54 }
 0x451   : > { %v638_v19 = vpop.f32.mrb[2].mxu1 }
 0x452   : > { %v642_v20 = vadd.f32 %v1794_v18, %v638_v19  ;;  %v2045_v23 = vpop.f32.mrb[3].mxu1 }
 0x454   : > { %2813 = vtanh.f32 %v642_v20 }
 0x45e   : > { %v2814_v26 = vpop.eup %2813 }
 0x45f   : > { %v646_v30 = vmul.f32 %v2814_v26, %v2812_v24 }
 0x461   : > { %v3488_v31 = vadd.f32 %v646_v30, %v645_v29 }
 0x463   : > { %1797 = vst [vmem:[%s3311_s29 + $0x8] sm:$0xff] %v3488_v31  ;;  %719 = vmatmul.mubr.f32.vlgmr.msra.gmra.mrb[4].mxu0 %v3488_v31 }
 0x464   : > { %2427 = vmatpush1.bf16.msra.mxu0 %v3318_v9  ;;  %886 = vmatprep.mubr.f32.mxu0 %v3075_v8 }
 0x465   : > { %2429 = vmatprep.subr.bf16.mxu0 %v3320_v10 }
 0x468   : > { %2431 = vmatpush1.bf16.msra.mxu0 %v3324_v15 }
 0x469   : > { %2433 = vmatprep.subr.bf16.mxu0 %v3327_v16 }
 0x46c   : > { %2435 = vmatpush1.bf16.msra.mxu0 %v3330_v21 }
 0x46d   : > { %2437 = vmatprep.subr.bf16.mxu0 %v3333_v22 }
 0x470   : > { %2439 = vmatpush1.bf16.msra.mxu0 %v3336_v27 }
 0x471   : > { %2441 = vmatprep.subr.bf16.mxu0 %v3339_v28 }
 0x474   : > { %2443 = vmatpush1.bf16.msra.mxu0 %v3342_v33 }
 0x475   : > { %2445 = vmatprep.subr.bf16.mxu0 %v3345_v34 }
 0x478   : > { %2447 = vmatpush1.bf16.msra.mxu0 %v3348_v39 }
 0x479   : > { %2449 = vmatprep.subr.bf16.mxu0 %v3351_v40 }
 0x47c   : > { %2451 = vmatpush1.bf16.msra.mxu0 %v3354_v45 }
 0x47d   : > { %2453 = vmatprep.subr.bf16.mxu0 %v3357_v46 }
 0x480   : > { %2455 = vmatpush1.bf16.msra.mxu0 %v3360_v49 }
 0x481   : > { %2481 = vmatprep.subr.bf16.mxu0 %v3315_v4 }
 0x536   : > { %v720_v35 = vpop.f32.mrb[4].mxu0 }
 0x537   : > { %v722_v36 = vpop.f32.mrb[5].mxu0  ;;  %v725_v48 = vadd.f32 %v1798_v47, %v720_v35 }
 0x538   : > { %v732_v37 = vadd.f32 %v1799_v32, %v722_v36  ;;  %v1806_v32 = vld [vmem:[%s3296_s12 + $0x58] sm:$0xff] }
 0x539   : > { %v1801_v51 = vmul.f32 -1.442695, %v725_v48  ;;  %v1811_v48 = vld [vmem:[%s3296_s12 + $0x68] sm:$0xff] }
 0x53a   : > { %v1802_v38 = vmul.f32 -1.442695, %v732_v37 }
 0x53c   : > { %2815 = vpow2.f32 %v1802_v38 }
 0x546   : > { %v2816_v41 = vpop.eup %2815 }
 0x547   : > { %v736_v42 = vadd.f32 1.0, %v2816_v41 }
 0x549   : > { %2817 = vrcp.f32 %v736_v42 }
 0x54a   : > { %2819 = vpow2.f32 %v1801_v51 }
 0x553   : > { %v2818_v43 = vpop.eup %2817 }
 0x554   : > { %v739_v44 = vmul.f32 %v2818_v43, %v3488_v31  ;;  %v2820_v52 = vpop.eup %2819 }
 0x555   : > { %v729_v55 = vadd.f32 1.0, %v2820_v52 }
 0x556   : > { %2079 = vmatmul.mubr.f32.vlgmr.msra.gmra.mrb[4].mxu1 %v739_v44 }
 0x557   : > { %2458 = vmatpush3.bf16.msra.mxu1 %v3385_v53  ;;  %2113 = vmatprep.mubr.msk.f32.mxu1 %vm3077_vm0, %v3075_v8  ;;  %2821 = vrcp.f32 %v729_v55 }
 0x558   : > { %2459 = vmatprep.subr.bf16.mxu1 %v3076_v54 }
 0x55b   : > { %2461 = vmatpush3.bf16.msra.mxu1 %v3390_v57 }
 0x55c   : > { %2462 = vmatprep.subr.bf16.mxu1 %v3076_v54 }
 0x55f   : > { %2464 = vmatpush3.bf16.msra.mxu1 %v3394_v60 }
 0x560   : > { %2465 = vmatprep.subr.bf16.mxu1 %v3076_v54 }
 0x561   : > { %v2822_v61 = vpop.eup %2821 }
 0x562   : > { %v812_v62 = vsub.f32 1.0, %v2822_v61 }
 0x563   : > { %2467 = vmatpush3.bf16.msra.mxu1 %v3398_v63 }
 0x564   : > { %2468 = vmatprep.subr.bf16.mxu1 %v3076_v54  ;;  %v813_v1 = vmul.f32 %v812_v62, %v3488_v31  ;;  %v1810_v62 = vld [vmem:[%s3296_s12 + $0x60] sm:$0xff] }
 0x567   : > { %2470 = vmatpush3.bf16.msra.mxu1 %v3402_v2 }
 0x568   : > { %2471 = vmatprep.subr.bf16.mxu1 %v3076_v54 }
 0x56b   : > { %2473 = vmatpush3.bf16.msra.mxu1 %v3406_v6 }
 0x56c   : > { %2474 = vmatprep.subr.bf16.mxu1 %v3076_v54 }
 0x56f   : > { %2476 = vmatpush3.bf16.msra.mxu1 %v3411_v12 }
 0x570   : > { %2477 = vmatprep.subr.bf16.mxu1 %v3076_v54 }
 0x573   : > { %2479 = vmatpush3.bf16.msra.mxu1 %v3415_v17 }
 0x574   : > { %2512 = vmatprep.subr.bf16.mxu1 %v3076_v54 }
 0x629   : > { %v806_v56 = vpop.f32.mrb[4].mxu1 }
 0x62a   : > { %v810_v58 = vadd.f32 %v1800_v50, %v806_v56  ;;  %v2080_v59 = vpop.f32.mrb[5].mxu1 }
 0x62c   : > { %2823 = vtanh.f32 %v810_v58 }
 0x636   : > { %v2824_v0 = vpop.eup %2823 }
 0x637   : > { %v814_v3 = vmul.f32 %v2824_v0, %v2822_v61 }
 0x639   : > { %v3533_v5 = vadd.f32 %v814_v3, %v813_v1 }
 0x63b   : > { %1803 = vst [vmem:[%s3311_s29 + $0x10] sm:$0xff] %v3533_v5  ;;  %887 = vmatmul.mubr.f32.vlgmr.msra.gmra.mrb[6].mxu0 %v3533_v5 }
 0x63c   : > { %2483 = vmatpush1.bf16.msra.mxu0 %v3318_v9  ;;  %1054 = vmatprep.mubr.f32.mxu0 %v3075_v8 }
 0x63d   : > { %2485 = vmatprep.subr.bf16.mxu0 %v3320_v10 }
 0x640   : > { %2487 = vmatpush1.bf16.msra.mxu0 %v3324_v15 }
 0x641   : > { %2489 = vmatprep.subr.bf16.mxu0 %v3327_v16 }
 0x644   : > { %2491 = vmatpush1.bf16.msra.mxu0 %v3330_v21 }
 0x645   : > { %2493 = vmatprep.subr.bf16.mxu0 %v3333_v22 }
 0x648   : > { %2495 = vmatpush1.bf16.msra.mxu0 %v3336_v27 }
 0x649   : > { %2497 = vmatprep.subr.bf16.mxu0 %v3339_v28 }
 0x64c   : > { %2499 = vmatpush1.bf16.msra.mxu0 %v3342_v33 }
 0x64d   : > { %2501 = vmatprep.subr.bf16.mxu0 %v3345_v34 }
 0x650   : > { %2503 = vmatpush1.bf16.msra.mxu0 %v3348_v39 }
 0x651   : > { %2505 = vmatprep.subr.bf16.mxu0 %v3351_v40 }
 0x654   : > { %2507 = vmatpush1.bf16.msra.mxu0 %v3354_v45 }
 0x655   : > { %2509 = vmatprep.subr.bf16.mxu0 %v3357_v46 }
 0x658   : > { %2511 = vmatpush1.bf16.msra.mxu0 %v3360_v49 }
 0x659   : > { %2537 = vmatprep.subr.bf16.mxu0 %v3315_v4 }
 0x70e   : > { %v888_v11 = vpop.f32.mrb[6].mxu0 }
 0x70f   : > { %v890_v13 = vpop.f32.mrb[7].mxu0  ;;  %v893_v26 = vadd.f32 %v1804_v25, %v888_v11 }
 0x710   : > { %v900_v14 = vadd.f32 %v1805_v7, %v890_v13  ;;  %v1812_v7 = vld [vmem:[%s3296_s12 + $0x70] sm:$0xff] }
 0x711   : > { %v1807_v29 = vmul.f32 -1.442695, %v893_v26  ;;  %v1817_v26 = vld [vmem:[%s3296_s12 + $0x80] sm:$0xff] }
 0x712   : > { %v1808_v18 = vmul.f32 -1.442695, %v900_v14 }
 0x714   : > { %2825 = vpow2.f32 %v1808_v18 }
 0x71e   : > { %v2826_v19 = vpop.eup %2825 }
 0x71f   : > { %v904_v20 = vadd.f32 1.0, %v2826_v19 }
 0x721   : > { %2827 = vrcp.f32 %v904_v20 }
 0x722   : > { %2829 = vpow2.f32 %v1807_v29 }
 0x72b   : > { %v2828_v23 = vpop.eup %2827 }
 0x72c   : > { %v907_v24 = vmul.f32 %v2828_v23, %v3533_v5  ;;  %v2830_v30 = vpop.eup %2829 }
 0x72d   : > { %v897_v31 = vadd.f32 1.0, %v2830_v30 }
 0x72e   : > { %2114 = vmatmul.mubr.f32.vlgmr.msra.gmra.mrb[6].mxu1 %v907_v24 }
 0x72f   : > { %2514 = vmatpush3.bf16.msra.mxu1 %v3385_v53  ;;  %2148 = vmatprep.mubr.msk.f32.mxu1 %vm3077_vm0, %v3075_v8  ;;  %2831 = vrcp.f32 %v897_v31 }
 0x730   : > { %2515 = vmatprep.subr.bf16.mxu1 %v3076_v54 }
 0x733   : > { %2517 = vmatpush3.bf16.msra.mxu1 %v3390_v57 }
 0x734   : > { %2518 = vmatprep.subr.bf16.mxu1 %v3076_v54 }
 0x737   : > { %2520 = vmatpush3.bf16.msra.mxu1 %v3394_v60 }
 0x738   : > { %2521 = vmatprep.subr.bf16.mxu1 %v3076_v54 }
 0x739   : > { %v2832_v38 = vpop.eup %2831 }
 0x73a   : > { %v980_v41 = vsub.f32 1.0, %v2832_v38 }
 0x73b   : > { %2523 = vmatpush3.bf16.msra.mxu1 %v3398_v63 }
 0x73c   : > { %2524 = vmatprep.subr.bf16.mxu1 %v3076_v54  ;;  %v981_v43 = vmul.f32 %v980_v41, %v3533_v5 }
 0x73f   : > { %2526 = vmatpush3.bf16.msra.mxu1 %v3402_v2 }
 0x740   : > { %2527 = vmatprep.subr.bf16.mxu1 %v3076_v54 }
 0x743   : > { %2529 = vmatpush3.bf16.msra.mxu1 %v3406_v6 }
 0x744   : > { %2530 = vmatprep.subr.bf16.mxu1 %v3076_v54 }
 0x747   : > { %2532 = vmatpush3.bf16.msra.mxu1 %v3411_v12 }
 0x748   : > { %2533 = vmatprep.subr.bf16.mxu1 %v3076_v54 }
 0x74b   : > { %2535 = vmatpush3.bf16.msra.mxu1 %v3415_v17 }
 0x74c   : > { %2568 = vmatprep.subr.bf16.mxu1 %v3076_v54 }
 0x801   : > { %v974_v35 = vpop.f32.mrb[6].mxu1 }
 0x802   : > { %v978_v36 = vadd.f32 %v1806_v32, %v974_v35  ;;  %v2115_v37 = vpop.f32.mrb[7].mxu1 }
 0x804   : > { %2833 = vtanh.f32 %v978_v36 }
 0x80e   : > { %v2834_v42 = vpop.eup %2833 }
 0x80f   : > { %v982_v44 = vmul.f32 %v2834_v42, %v2832_v38 }
 0x811   : > { %v3578_v47 = vadd.f32 %v982_v44, %v981_v43 }
 0x813   : > { %1809 = vst [vmem:[%s3311_s29 + $0x18] sm:$0xff] %v3578_v47  ;;  %1055 = vmatmul.mubr.f32.vlgmr.msra.gmra.mrb[8].mxu0 %v3578_v47 }
 0x814   : > { %2539 = vmatpush1.bf16.msra.mxu0 %v3318_v9  ;;  %1222 = vmatprep.mubr.f32.mxu0 %v3075_v8 }
 0x815   : > { %2541 = vmatprep.subr.bf16.mxu0 %v3320_v10 }
 0x818   : > { %2543 = vmatpush1.bf16.msra.mxu0 %v3324_v15 }
 0x819   : > { %2545 = vmatprep.subr.bf16.mxu0 %v3327_v16 }
 0x81c   : > { %2547 = vmatpush1.bf16.msra.mxu0 %v3330_v21 }
 0x81d   : > { %2549 = vmatprep.subr.bf16.mxu0 %v3333_v22 }
 0x820   : > { %2551 = vmatpush1.bf16.msra.mxu0 %v3336_v27 }
 0x821   : > { %2553 = vmatprep.subr.bf16.mxu0 %v3339_v28 }
 0x824   : > { %2555 = vmatpush1.bf16.msra.mxu0 %v3342_v33 }
 0x825   : > { %2557 = vmatprep.subr.bf16.mxu0 %v3345_v34 }
 0x828   : > { %2559 = vmatpush1.bf16.msra.mxu0 %v3348_v39 }
 0x829   : > { %2561 = vmatprep.subr.bf16.mxu0 %v3351_v40 }
 0x82c   : > { %2563 = vmatpush1.bf16.msra.mxu0 %v3354_v45 }
 0x82d   : > { %2565 = vmatprep.subr.bf16.mxu0 %v3357_v46 }
 0x830   : > { %2567 = vmatpush1.bf16.msra.mxu0 %v3360_v49 }
 0x831   : > { %2593 = vmatprep.subr.bf16.mxu0 %v3315_v4 }
 0x8e6   : > { %v1056_v51 = vpop.f32.mrb[8].mxu0 }
 0x8e7   : > { %v1058_v52 = vpop.f32.mrb[9].mxu0  ;;  %v1061_v0 = vadd.f32 %v1810_v62, %v1056_v51 }
 0x8e8   : > { %v1068_v55 = vadd.f32 %v1811_v48, %v1058_v52 }
 0x8e9   : > { %v1813_v1 = vmul.f32 -1.442695, %v1061_v0 }
 0x8ea   : > { %v1814_v50 = vmul.f32 -1.442695, %v1068_v55 }
 0x8ec   : > { %2835 = vpow2.f32 %v1814_v50 }
 0x8f6   : > { %v2836_v56 = vpop.eup %2835 }
 0x8f7   : > { %v1072_v58 = vadd.f32 1.0, %v2836_v56 }
 0x8f9   : > { %2837 = vrcp.f32 %v1072_v58 }
 0x8fa   : > { %2839 = vpow2.f32 %v1813_v1 }
 0x903   : > { %v2838_v59 = vpop.eup %2837 }
 0x904   : > { %v1075_v61 = vmul.f32 %v2838_v59, %v3578_v47  ;;  %v2840_v3 = vpop.eup %2839 }
 0x905   : > { %v1065_v5 = vadd.f32 1.0, %v2840_v3 }
 0x906   : > { %2149 = vmatmul.mubr.f32.vlgmr.msra.gmra.mrb[8].mxu1 %v1075_v61 }
 0x907   : > { %2570 = vmatpush3.bf16.msra.mxu1 %v3385_v53  ;;  %2183 = vmatprep.mubr.msk.f32.mxu1 %vm3077_vm0, %v3075_v8  ;;  %2841 = vrcp.f32 %v1065_v5 }
 0x908   : > { %2571 = vmatprep.subr.bf16.mxu1 %v3076_v54 }
 0x90b   : > { %2573 = vmatpush3.bf16.msra.mxu1 %v3390_v57 }
 0x90c   : > { %2574 = vmatprep.subr.bf16.mxu1 %v3076_v54 }
 0x90f   : > { %2576 = vmatpush3.bf16.msra.mxu1 %v3394_v60 }
 0x910   : > { %2577 = vmatprep.subr.bf16.mxu1 %v3076_v54 }
 0x911   : > { %v2842_v18 = vpop.eup %2841 }
 0x912   : > { %v1148_v19 = vsub.f32 1.0, %v2842_v18 }
 0x913   : > { %2579 = vmatpush3.bf16.msra.mxu1 %v3398_v63 }
 0x914   : > { %2580 = vmatprep.subr.bf16.mxu1 %v3076_v54  ;;  %v1149_v23 = vmul.f32 %v1148_v19, %v3578_v47  ;;  %v1818_v47 = vld [vmem:[%s3296_s12 + $0x88] sm:$0xff] }
 0x917   : > { %2582 = vmatpush3.bf16.msra.mxu1 %v3402_v2 }
 0x918   : > { %2583 = vmatprep.subr.bf16.mxu1 %v3076_v54 }
 0x91b   : > { %2585 = vmatpush3.bf16.msra.mxu1 %v3406_v6 }
 0x91c   : > { %2586 = vmatprep.subr.bf16.mxu1 %v3076_v54 }
 0x91f   : > { %2588 = vmatpush3.bf16.msra.mxu1 %v3411_v12 }
 0x920   : > { %2589 = vmatprep.subr.bf16.mxu1 %v3076_v54 }
 0x923   : > { %2591 = vmatpush3.bf16.msra.mxu1 %v3415_v17 }
 0x924   : > { %2624 = vmatprep.subr.bf16.mxu1 %v3076_v54 }
 0x9d9   : > { %v1142_v11 = vpop.f32.mrb[8].mxu1 }
 0x9da   : > { %v1146_v13 = vadd.f32 %v1812_v7, %v1142_v11  ;;  %v2150_v14 = vpop.f32.mrb[9].mxu1 }
 0x9db   : > { %v1828_v14 = vld [vmem:[%s3296_s12 + $0xa8] sm:$0xff] }
 0x9dc   : > { %2843 = vtanh.f32 %v1146_v13 }
 0x9e6   : > { %v2844_v20 = vpop.eup %2843 }
 0x9e7   : > { %v1150_v24 = vmul.f32 %v2844_v20, %v2842_v18 }
 0x9e9   : > { %v3623_v25 = vadd.f32 %v1150_v24, %v1149_v23  ;;  %v1830_v24 = vld [vmem:[%s3296_s12 + $0xb8] sm:$0xff] }
 0x9eb   : > { %1815 = vst [vmem:[%s3311_s29 + $0x20] sm:$0xff] %v3623_v25  ;;  %1223 = vmatmul.mubr.f32.vlgmr.msra.gmra.mrb[10].mxu0 %v3623_v25 }
 0x9ec   : > { %2595 = vmatpush1.bf16.msra.mxu0 %v3318_v9  ;;  %1390 = vmatprep.mubr.f32.mxu0 %v3075_v8 }
 0x9ed   : > { %2597 = vmatprep.subr.bf16.mxu0 %v3320_v10 }
 0x9f0   : > { %2599 = vmatpush1.bf16.msra.mxu0 %v3324_v15 }
 0x9f1   : > { %2601 = vmatprep.subr.bf16.mxu0 %v3327_v16 }
 0x9f4   : > { %2603 = vmatpush1.bf16.msra.mxu0 %v3330_v21 }
 0x9f5   : > { %2605 = vmatprep.subr.bf16.mxu0 %v3333_v22 }
 0x9f8   : > { %2607 = vmatpush1.bf16.msra.mxu0 %v3336_v27 }
 0x9f9   : > { %2609 = vmatprep.subr.bf16.mxu0 %v3339_v28 }
 0x9fc   : > { %2611 = vmatpush1.bf16.msra.mxu0 %v3342_v33 }
 0x9fd   : > { %2613 = vmatprep.subr.bf16.mxu0 %v3345_v34 }
 0xa00   : > { %2615 = vmatpush1.bf16.msra.mxu0 %v3348_v39 }
 0xa01   : > { %2617 = vmatprep.subr.bf16.mxu0 %v3351_v40 }
 0xa04   : > { %2619 = vmatpush1.bf16.msra.mxu0 %v3354_v45 }
 0xa05   : > { %2621 = vmatprep.subr.bf16.mxu0 %v3357_v46 }
 0xa08   : > { %2623 = vmatpush1.bf16.msra.mxu0 %v3360_v49 }
 0xa09   : > { %2649 = vmatprep.subr.bf16.mxu0 %v3315_v4  ;;  %v1816_v4 = vld [vmem:[%s3296_s12 + $0x78] sm:$0xff] }
 0xabe   : > { %v1224_v29 = vpop.f32.mrb[10].mxu0 }
 0xabf   : > { %v1226_v30 = vpop.f32.mrb[11].mxu0  ;;  %v1229_v41 = vadd.f32 %v1816_v4, %v1224_v29 }
 0xac0   : > { %v1236_v31 = vadd.f32 %v1817_v26, %v1226_v30 }
 0xac1   : > { %v1819_v42 = vmul.f32 -1.442695, %v1229_v41 }
 0xac2   : > { %v1820_v32 = vmul.f32 -1.442695, %v1236_v31 }
 0xac4   : > { %2845 = vpow2.f32 %v1820_v32 }
 0xace   : > { %v2846_v35 = vpop.eup %2845 }
 0xacf   : > { %v1240_v36 = vadd.f32 1.0, %v2846_v35 }
 0xad1   : > { %2847 = vrcp.f32 %v1240_v36 }
 0xad2   : > { %2849 = vpow2.f32 %v1819_v42 }
 0xadb   : > { %v2848_v37 = vpop.eup %2847 }
 0xadc   : > { %v1243_v38 = vmul.f32 %v2848_v37, %v3623_v25  ;;  %v2850_v43 = vpop.eup %2849 }
 0xadd   : > { %v1233_v44 = vadd.f32 1.0, %v2850_v43 }
 0xade   : > { %2184 = vmatmul.mubr.f32.vlgmr.msra.gmra.mrb[10].mxu1 %v1243_v38 }
 0xadf   : > { %2626 = vmatpush3.bf16.msra.mxu1 %v3385_v53  ;;  %2218 = vmatprep.mubr.msk.f32.mxu1 %vm3077_vm0, %v3075_v8  ;;  %2851 = vrcp.f32 %v1233_v44 }
 0xae0   : > { %2627 = vmatprep.subr.bf16.mxu1 %v3076_v54 }
 0xae3   : > { %2629 = vmatpush3.bf16.msra.mxu1 %v3390_v57 }
 0xae4   : > { %2630 = vmatprep.subr.bf16.mxu1 %v3076_v54 }
 0xae7   : > { %2632 = vmatpush3.bf16.msra.mxu1 %v3394_v60 }
 0xae8   : > { %2633 = vmatprep.subr.bf16.mxu1 %v3076_v54 }
 0xae9   : > { %v2852_v55 = vpop.eup %2851 }
 0xaea   : > { %v1316_v50 = vsub.f32 1.0, %v2852_v55 }
 0xaeb   : > { %2635 = vmatpush3.bf16.msra.mxu1 %v3398_v63 }
 0xaec   : > { %2636 = vmatprep.subr.bf16.mxu1 %v3076_v54  ;;  %v1317_v58 = vmul.f32 %v1316_v50, %v3623_v25 }
 0xaef   : > { %2638 = vmatpush3.bf16.msra.mxu1 %v3402_v2 }
 0xaf0   : > { %2639 = vmatprep.subr.bf16.mxu1 %v3076_v54 }
 0xaf3   : > { %2641 = vmatpush3.bf16.msra.mxu1 %v3406_v6 }
 0xaf4   : > { %2642 = vmatprep.subr.bf16.mxu1 %v3076_v54 }
 0xaf7   : > { %2644 = vmatpush3.bf16.msra.mxu1 %v3411_v12 }
 0xaf8   : > { %2645 = vmatprep.subr.bf16.mxu1 %v3076_v54 }
 0xafb   : > { %2647 = vmatpush3.bf16.msra.mxu1 %v3415_v17 }
 0xafc   : > { %2680 = vmatprep.subr.bf16.mxu1 %v3076_v54 }
 0xbb1   : > { %v1310_v48 = vpop.f32.mrb[10].mxu1 }
 0xbb2   : > { %v1314_v51 = vadd.f32 %v1818_v47, %v1310_v48  ;;  %v2185_v52 = vpop.f32.mrb[11].mxu1 }
 0xbb4   : > { %2853 = vtanh.f32 %v1314_v51 }
 0xbbe   : > { %v2854_v56 = vpop.eup %2853 }
 0xbbf   : > { %v1318_v59 = vmul.f32 %v2854_v56, %v2852_v55 }
 0xbc1   : > { %v1319_v61 = vadd.f32 %v1318_v59, %v1317_v58 }
 0xbc3   : > { %1821 = vst [vmem:[%s3311_s29 + $0x28] sm:$0xff] %v1319_v61  ;;  %1391 = vmatmul.mubr.f32.vlgmr.msra.gmra.mrb[12].mxu0 %v1319_v61 }
 0xbc4   : > { %2651 = vmatpush1.bf16.msra.mxu0 %v3318_v9  ;;  %1558 = vmatprep.mubr.f32.mxu0 %v3075_v8  ;;  %v1823_v9 = vld [vmem:[%s3296_s12 + $0x98] sm:$0xff] }
 0xbc5   : > { %2653 = vmatprep.subr.bf16.mxu0 %v3320_v10 }
 0xbc8   : > { %2655 = vmatpush1.bf16.msra.mxu0 %v3324_v15 }
 0xbc9   : > { %2657 = vmatprep.subr.bf16.mxu0 %v3327_v16 }
 0xbcc   : > { %2659 = vmatpush1.bf16.msra.mxu0 %v3330_v21 }
 0xbcd   : > { %2661 = vmatprep.subr.bf16.mxu0 %v3333_v22 }
 0xbd0   : > { %2663 = vmatpush1.bf16.msra.mxu0 %v3336_v27 }
 0xbd1   : > { %2665 = vmatprep.subr.bf16.mxu0 %v3339_v28 }
 0xbd4   : > { %2667 = vmatpush1.bf16.msra.mxu0 %v3342_v33 }
 0xbd5   : > { %2669 = vmatprep.subr.bf16.mxu0 %v3345_v34 }
 0xbd8   : > { %2671 = vmatpush1.bf16.msra.mxu0 %v3348_v39 }
 0xbd9   : > { %2673 = vmatprep.subr.bf16.mxu0 %v3351_v40 }
 0xbdc   : > { %2675 = vmatpush1.bf16.msra.mxu0 %v3354_v45 }
 0xbdd   : > { %2677 = vmatprep.subr.bf16.mxu0 %v3357_v46  ;;  %v1824_v46 = vld [vmem:[%s3296_s12 + $0xa0] sm:$0xff] }
 0xbe0   : > { %2679 = vmatpush1.bf16.msra.mxu0 %v3360_v49 }
 0xc96   : > { %v1392_v10 = vpop.f32.mrb[12].mxu0 }
 0xc97   : > { %v1394_v15 = vpop.f32.mrb[13].mxu0 }
 0xc98   : > { %v1404_v16 = vadd.f32 %v1823_v9, %v1394_v15 }
 0xc9a   : > { %v1826_v21 = vmul.f32 -1.442695, %v1404_v16 }
 0xc9c   : > { %2855 = vpow2.f32 %v1826_v21 }
 0xca6   : > { %v2856_v22 = vpop.eup %2855 }
 0xca7   : > { %v1408_v27 = vadd.f32 1.0, %v2856_v22 }
 0xca9   : > { %2857 = vrcp.f32 %v1408_v27 }
 0xcb3   : > { %v2858_v28 = vpop.eup %2857 }
 0xcb4   : > { %v1411_v33 = vmul.f32 %v2858_v28, %v1319_v61 }
 0xcb6   : > { %2219 = vmatmul.mubr.f32.vlgmr.msra.gmra.mrb[12].mxu1 %v1411_v33 }
 0xcb7   : > { %2682 = vmatpush3.bf16.msra.mxu1 %v3385_v53  ;;  %2253 = vmatprep.mubr.msk.f32.mxu1 %vm3077_vm0, %v3075_v8  ;;  %v1822_v8 = vld [vmem:[%s3296_s12 + $0x90] sm:$0xff] }
 0xcb8   : > { %2683 = vmatprep.subr.bf16.mxu1 %v3076_v54  ;;  %v1397_v34 = vadd.f32 %v1822_v8, %v1392_v10 }
 0xcba   : > { %v1825_v39 = vmul.f32 -1.442695, %v1397_v34 }
 0xcbb   : > { %2685 = vmatpush3.bf16.msra.mxu1 %v3390_v57 }
 0xcbc   : > { %2686 = vmatprep.subr.bf16.mxu1 %v3076_v54  ;;  %2859 = vpow2.f32 %v1825_v39 }
 0xcbf   : > { %2688 = vmatpush3.bf16.msra.mxu1 %v3394_v60 }
 0xcc0   : > { %2689 = vmatprep.subr.bf16.mxu1 %v3076_v54 }
 0xcc3   : > { %2691 = vmatpush3.bf16.msra.mxu1 %v3398_v63 }
 0xcc4   : > { %2692 = vmatprep.subr.bf16.mxu1 %v3076_v54 }
 0xcc6   : > { %v2860_v40 = vpop.eup %2859 }
 0xcc7   : > { %2694 = vmatpush3.bf16.msra.mxu1 %v3402_v2  ;;  %v1401_v45 = vadd.f32 1.0, %v2860_v40 }
 0xcc8   : > { %2695 = vmatprep.subr.bf16.mxu1 %v3076_v54 }
 0xcc9   : > { %2861 = vrcp.f32 %v1401_v45 }
 0xccb   : > { %2697 = vmatpush3.bf16.msra.mxu1 %v3406_v6 }
 0xccc   : > { %2698 = vmatprep.subr.bf16.mxu1 %v3076_v54 }
 0xccf   : > { %2700 = vmatpush3.bf16.msra.mxu1 %v3411_v12 }
 0xcd0   : > { %2701 = vmatprep.subr.bf16.mxu1 %v3076_v54 }
 0xcd3   : > { %2703 = vmatpush3.bf16.msra.mxu1 %v3415_v17  ;;  %v2862_v60 = vpop.eup %2861  ;;  %v1829_v17 = vld [vmem:[%s3296_s12 + $0xb0] sm:$0xff] }
 0xcd4   : > { %v1484_v63 = vsub.f32 1.0, %v2862_v60 }
 0xcd6   : > { %v1485_v54 = vmul.f32 %v1484_v63, %v1319_v61 }
 0xd89   : > { %v1478_v49 = vpop.f32.mrb[12].mxu1 }
 0xd8a   : > { %v1482_v53 = vadd.f32 %v1824_v46, %v1478_v49  ;;  %v2220_v57 = vpop.f32.mrb[13].mxu1 }
 0xd8c   : > { %2863 = vtanh.f32 %v1482_v53 }
 0xd96   : > { %v2864_v2 = vpop.eup %2863 }
 0xd97   : > { %v1486_v6 = vmul.f32 %v2864_v2, %v2862_v60 }
 0xd99   : > { %v1487_v12 = vadd.f32 %v1486_v6, %v1485_v54 }
 0xd9b   : > { %1827 = vst [vmem:[%s3311_s29 + $0x30] sm:$0xff] %v1487_v12  ;;  %1559 = vmatmul.mubr.f32.vlgmr.msra.gmra.mrb[14].mxu0 %v1487_v12 }
 0xe6e   : > { %v1560_v62 = vpop.f32.mrb[14].mxu0 }
 0xe6f   : > { %v1562_v0 = vpop.f32.mrb[15].mxu0  ;;  %v1565_v18 = vadd.f32 %v1828_v14, %v1560_v62 }
 0xe70   : > { %v1572_v1 = vadd.f32 %v1829_v17, %v1562_v0 }
 0xe71   : > { %v1831_v19 = vmul.f32 -1.442695, %v1565_v18 }
 0xe72   : > { %v1832_v3 = vmul.f32 -1.442695, %v1572_v1 }
 0xe74   : > { %2865 = vpow2.f32 %v1832_v3 }
 0xe7e   : > { %v2866_v5 = vpop.eup %2865 }
 0xe7f   : > { %v1576_v7 = vadd.f32 1.0, %v2866_v5 }
 0xe81   : > { %2867 = vrcp.f32 %v1576_v7 }
 0xe82   : > { %2869 = vpow2.f32 %v1831_v19 }
 0xe8b   : > { %v2868_v11 = vpop.eup %2867 }
 0xe8c   : > { %v1579_v13 = vmul.f32 %v2868_v11, %v1487_v12  ;;  %v2870_v20 = vpop.eup %2869 }
 0xe8d   : > { %v1569_v23 = vadd.f32 1.0, %v2870_v20 }
 0xe8e   : > { %2254 = vmatmul.mubr.f32.vlgmr.msra.gmra.mrb[14].mxu1 %v1579_v13 }
 0xe8f   : > { %2871 = vrcp.f32 %v1569_v23 }
 0xe99   : > { %v2872_v30 = vpop.eup %2871 }
 0xe9a   : > { %v1652_v31 = vsub.f32 1.0, %v2872_v30 }
 0xe9c   : > { %v1653_v35 = vmul.f32 %v1652_v31, %v1487_v12 }
 0xf61   : > { %v1646_v25 = vpop.f32.mrb[14].mxu1 }
 0xf62   : > { %v1650_v26 = vadd.f32 %v1830_v24, %v1646_v25  ;;  %v2255_v29 = vpop.f32.mrb[15].mxu1 }
 0xf64   : > { %2873 = vtanh.f32 %v1650_v26 }
 0xf6e   : > { %v2874_v32 = vpop.eup %2873 }
 0xf6f   : > { %v1654_v36 = vmul.f32 %v2874_v32, %v2872_v30 }
 0xf71   : > { %v1655_v37 = vadd.f32 %v1654_v36, %v1653_v35 }
 0xf73   : > { %1833 = vst [vmem:[%s3311_s29 + $0x38] sm:$0xff] %v1655_v37  ;;  %1658 = vst [vmem:[#allocation2] sm:$0xff] %v1655_v37 }
 0xf74   : > { %3002 = shalt.err (!%p2999_p0)
}
 0xf75   : > { %s3003_s6 = scalar_lea.hbm %s3714_s20, 1024  ;;  %s3007_s11 = scalar_lea.hbm %s3764_s4, 3072 }
 0xf76   : > { %p3004_p5 = scmp.ne.s32.totalorder %s3714_s20, %s3003_s6  ;;  %p3008_p12 = scmp.lt.u32.totalorder %s3714_s20, %s3764_s4 }
 0xf77   : > { %p3009_p2 = scmp.lt.u32.totalorder %s3007_s11, %s3003_s6  ;;  %p3011_p4 = scmp.lt.u32.totalorder %s3003_s6, %s3714_s20 }
 0xf78   : > { %p3005_p11 = pnand %p3004_p5, %p3244_p6 }
 0xf79   : > { %p3010_p1 = por %p3009_p2, %p3008_p12 }
 0xf7a   : > { %p3006_p8 = pneg %p3005_p11 }
 0xf7b   : > { %p3012_p9 = por %p3011_p4, %p3010_p1 }
 0xf7d   : > { %p3013_p3 = pnand %p3012_p9, %p3006_p8 }
 0xf7f   : > { %3016 = shalt.err (!%p3013_p3)
}
 0xf80   : > { %s3079_s29 = smov 128   ;;  %s3080_s21 = smov 8  }
 0xf81   : > { %2721 = dma.vmem_to_hbm [thread:$0]  (%p3244_p6), %s3716_s5, 1024, %s3714_s20, %s1660_s28, %s3079_s29, %s3079_s29, %s3080_s21  }
 0xf82 PF: > { %p2748_p7 = scmp.ge.s32.totalorder %s3063_s18, 2  ;;  %s1688_s7 = sand.u32 1, %s3051_s15  }
 0xf83   : > { %p3783_p10 = scmp.ne.s32.totalorder %s3769_s22, 0  ;;  %s1689_s27 = scalar_lea.sflag [#allocation5], %s1688_s7 }
 0xf85   : > { %p2738_p13 = pnand %p2748_p7, %p3783_p10 }
 0xf87   : > { %3046 = dma.done.wait (!%p2738_p13), %s1689_s27, 1024  }
 0xf88   : > { %3048 = vsyncadd (!%p2738_p13), %s1689_s27, 4294966272  ;;  %p19_p0 = scmp.ge.s32.totalorder %s3230_s9, 5   ;;  %s3784_s15 = smov %s3055_s16 }
 0xf89   : > { %s3785_s16 = smov %s3059_s17  ;;  %s3786_s17 = smov %s3240_s13 }
 0xf8a   : > { %s3787_s18 = smov %s3230_s9  ;;  %21 = sbr.rel (!%p19_p0) target bundleno = 7 (0x7), region = 111 }
 0xf91   :  { %1694 = vsyncpa [#allocation4], 1 }
 0xf92   :  { %1696 = vsyncpa [#allocation4 + $0x1], 1 }
 0xf93   :  { %1697 = vsyncpa [#allocation7], 1 }
 0xf94   :  { %1698 = vsyncpa [#allocation10], 1 }
 0xf95   :  { %1699 = vsyncpa [#allocation5], 1 }
 0xf96   :  { %1701 = vsyncpa [#allocation5 + $0x1], 1 }

</bundles_post_ra>
